<compile_context>
chip_gen: v5e
topology: v5e:2x2
jax: 0.10.0
libtpu: 0.0.40
codegen_flags: <defaults>
</compile_context>

<pallas_src>
import jax
import jax.numpy as jnp
import numpy as np
from jax import lax
from jax.experimental import pallas as pl
from jax.experimental.pallas import tpu as pltpu

VOCAB = 10   # len(vocab)
EMB = 3      # embedding_dim
HID = 32     # nb_lstm_units (small demo size)
NFAC = 3     # n_factors
BATCH = 3    # batch_size
SEQ = 8      # seq_len

# ---- static layout constants -------------------------------------------------
B_PAD = 8                    # batch rows padded to one full sublane group
V_PAD = 16                   # vocab rows padded to a multiple of 8 sublanes
W_COLS = 4 * HID             # 128 lanes: width of the packed weight slab
ROW_GT = 0                   # gate table  (V_PAD, 4H) = emb @ Wih^T + b   (g cols x2)
ROW_WHH = ROW_GT + V_PAD     # Whh^T       (H, 4H)                          (g cols x2)
ROW_WC = ROW_WHH + HID       # Wc flat     (H, NFAC*H) lane-padded to 128
ROW_WMY = ROW_WC + HID       # [Wm | Wy]   (H, VOCAB+1) lane-padded to 128
N_W_ROWS = ROW_WMY + HID     # 112
OUT_ROWS = B_PAD             # (8, 128) lane-dense, sublane-full output tile
OUT_COLS = W_COLS


def tutorial_lstm_kernel(xt_ref, len_ref, xc_ref, state_ref, w_ref, out_ref):
    """Embedding + LSTM recurrence + Wc gather + fused output matmul, all in VMEM."""
    T, BP = xt_ref.shape                 # (SEQ, B_PAD)
    NF, B = xc_ref.shape                 # (NFAC, BATCH)  -- SMEM scalars
    H = state_ref.shape[2]

    # ---- 8-row-aligned static views into the single packed weight slab -------
    gate_tbl = w_ref[ROW_GT:ROW_GT + V_PAD, :]       # (V_PAD, 4H)
    whh_t = w_ref[ROW_WHH:ROW_WHH + H, :]            # (H, 4H)
    wc_flat = w_ref[ROW_WC:ROW_WC + H, :]            # (H, 128)  [Wc0|Wc1|Wc2|0]
    wmy = w_ref[ROW_WMY:ROW_WMY + H, :]              # (H, 128)  [Wm|Wy|0]

    # ---- input gates for ALL timesteps: one (T*BP, V_PAD)x(V_PAD, 4H) MXU matmul,
    #      built time-major so the per-step read is a contiguous leading slice.
    #      (out-of-range token ids would silently hit a zero row -> zero gates.)
    xt = xt_ref[...]                                                        # (T, BP) int32
    onehot = (xt[:, :, None] ==
              lax.broadcasted_iota(jnp.int32, (T, BP, V_PAD), 2)).astype(jnp.float32)
    gates_x = jnp.dot(onehot.reshape(T * BP, V_PAD), gate_tbl,
                      preferred_element_type=jnp.float32).reshape(T, BP, 4 * H)

    # ---- sequence lengths (SMEM scalars) -> (BP,1) column; padded rows stay 0
    row_iota = lax.broadcasted_iota(jnp.int32, (BP, 1), 0)
    lens_col = jnp.zeros((BP, 1), jnp.int32)
    for b in range(B):
        lens_col = jnp.where(row_iota == b, len_ref[b], lens_col)

    h = state_ref[0]                                                        # (BP, H)
    c = state_ref[1]
    # ---- recurrence: fully unrolled (T static); per step the serial chain carries
    #      one h @ Whh^T dot, ONE full-width sigmoid, and one tanh(c_new).
    for t in range(T):
        gates = gates_x[t] + jnp.dot(h, whh_t, preferred_element_type=jnp.float32)
        sig = jax.nn.sigmoid(gates)                   # single EUP push on (BP, 4H)
        i = sig[:, 0 * H:1 * H]
        f = sig[:, 1 * H:2 * H]
        g = 2.0 * sig[:, 2 * H:3 * H] - 1.0           # tanh(x) = 2*sigmoid(2x)-1 (2x in weights)
        o = sig[:, 3 * H:4 * H]
        c_new = f * c + i * g
        h_new = o * jnp.tanh(c_new)
        valid = lens_col > t                          # pack_padded_sequence: freeze past length
        h = jnp.where(valid, h_new, h)
        c = jnp.where(valid, c_new, c)

    # ---- bc[b] = h[b] @ Wc[argmax(Xc,0)[b]]: in-kernel argmax on the scalar unit,
    #      one (BP,H)x(H,128) matmul, cheap per-block VPU select.
    bc_all = jnp.dot(h, wc_flat, preferred_element_type=jnp.float32)        # (BP, 128)
    idx_col = jnp.zeros((BP, 1), jnp.int32)
    for b in range(B):
        best_v = xc_ref[0, b]
        best_k = jnp.int32(0)
        for k in range(1, NF):
            take = xc_ref[k, b] > best_v              # strict ">" keeps first max (torch.argmax)
            best_v = jnp.where(take, xc_ref[k, b], best_v)
            best_k = jnp.where(take, jnp.int32(k), best_k)
        idx_col = jnp.where(row_iota == b, best_k, idx_col)
    bc = jnp.zeros((BP, H), jnp.float32)
    for k in range(NF):
        bc = bc + jnp.where(idx_col == k, bc_all[:, k * H:(k + 1) * H], 0.0)

    # ---- fused output projection straight into a full lane-dense (8,128) tile.
    out_ref[...] = jnp.dot(h + bc, wmy, preferred_element_type=jnp.float32)


def prepare_params(params):
    """One-time weight preprocessing (outside the per-call path).

    Everything static the kernel needs is packed into ONE lane-padded (112,128)
    f32 slab plus one (2, B_PAD, H) initial-state array -> few, large DMAs per call.
    """
    H = params["w_hh"].shape[1]
    V = params["embedding"].shape[0]
    NF = params["Wc"].shape[0]
    B = params["h0"].shape[0]

    # Fold the tanh-as-sigmoid 2x scale for the g-gate columns into weights + bias.
    gscale = jnp.ones((4 * H,), jnp.float32).at[2 * H:3 * H].set(2.0)

    gate_tbl = (params["embedding"] @ params["w_ih"].T
                + (params["b_ih"] + params["b_hh"])[None, :]) * gscale[None, :]   # (V, 4H)
    gate_tbl_pad = jnp.zeros((V_PAD, 4 * H), jnp.float32).at[:V, :].set(gate_tbl)

    whh_t = params["w_hh"].T * gscale[None, :]                                     # (H, 4H)

    Wc = params["Wc"]                                                              # (NF, H, H)
    wc_flat = jnp.transpose(Wc, (1, 0, 2)).reshape(H, NF * H)                      # (H, NF*H)
    wc_pad = jnp.zeros((H, W_COLS), jnp.float32).at[:, :NF * H].set(wc_flat)

    wmy_pad = (jnp.zeros((H, W_COLS), jnp.float32)
               .at[:, :V].set(params["Wm"])
               .at[:, V:V + 1].set(params["Wy"]))

    wslab = jnp.concatenate(
        [gate_tbl_pad, whh_t, wc_pad, wmy_pad], axis=0).astype(jnp.float32)
    assert wslab.shape == (N_W_ROWS, W_COLS)

    state0 = (jnp.zeros((2, B_PAD, H), jnp.float32)
              .at[0, :B].set(params["h0"])
              .at[1, :B].set(params["c0"]))
    return dict(wslab=wslab, state0=state0)


@jax.jit
def tutorial_lstm_forward(prep, X, X_lengths, Xc):
    B, T = X.shape
    V = VOCAB
    # Time-major, sublane-padded token slab (T x 8 int32). Lengths and Xc go into
    # SMEM untouched; argmax / masking happen in-kernel (no pre-call fusions).
    xt = jnp.zeros((T, B_PAD), jnp.int32).at[:, :B].set(X.T.astype(jnp.int32))

    vmem = pl.BlockSpec(memory_space=pltpu.MemorySpace.VMEM)
    smem = pl.BlockSpec(memory_space=pltpu.MemorySpace.SMEM)

    out = pl.pallas_call(
        tutorial_lstm_kernel,
        out_shape=jax.ShapeDtypeStruct((OUT_ROWS, OUT_COLS), jnp.float32),
        in_specs=[vmem, smem, smem, vmem, vmem],
        out_specs=vmem,
        # No grid: whole problem is ~100 KB of VMEM on v5e/v6e/v7x; grid steps would
        # be pure overhead at this size.
        # TODO(synk): for large batches add a leading "parallel" grid axis over row
        # blocks so v7x's second TensorCore is used.
    )(xt, X_lengths.astype(jnp.int32), Xc.astype(jnp.float32),
      prep["state0"], prep["wslab"])

    # PyTorch: hs has shape (1, B, H) so outputs are (1, B, VOCAB) and (1, B, 1).
    return out[:B, :V][None], out[:B, V:V + 1][None]


def reference_forward(params, X, X_lengths, Xc):
    """Pure-JAX reference of the PyTorch forward pass."""
    emb = params["embedding"]
    w_ih, w_hh = params["w_ih"], params["w_hh"]
    b = params["b_ih"] + params["b_hh"]
    Wc, Wm, Wy = params["Wc"], params["Wm"], params["Wy"]
    h, c = params["h0"], params["c0"]
    B, T = X.shape
    H = w_hh.shape[1]
    x_emb = emb[X]
    for t in range(T):
        x_t = x_emb[:, t, :]
        gates = x_t @ w_ih.T + h @ w_hh.T + b
        i = jax.nn.sigmoid(gates[:, :H]); f = jax.nn.sigmoid(gates[:, H:2 * H])
        g = jnp.tanh(gates[:, 2 * H:3 * H]); o = jax.nn.sigmoid(gates[:, 3 * H:])
        c_new = f * c + i * g
        h_new = o * jnp.tanh(c_new)
        m = (t < X_lengths)[:, None]
        h = jnp.where(m, h_new, h); c = jnp.where(m, c_new, c)
    idx = jnp.argmax(Xc, axis=0)
    bc = jnp.einsum('bh,bhk->bk', h, Wc[idx])
    hb = h + bc
    return (hb @ Wm)[None], (hb @ Wy)[None]


if __name__ == "__main__":
    key = jax.random.PRNGKey(0)
    ks = jax.random.split(key, 12)
    H = HID
    scale = 1.0 / np.sqrt(H)

    embedding = jax.random.normal(ks[0], (VOCAB, EMB), jnp.float32)
    embedding = embedding.at[0].set(0.0)        # padding_idx = vocab['<PAD>'] = 0

    params = dict(
        embedding=embedding,
        w_ih=jax.random.uniform(ks[1], (4 * H, EMB), jnp.float32, -scale, scale),
        w_hh=jax.random.uniform(ks[2], (4 * H, H), jnp.float32, -scale, scale),
        b_ih=jax.random.uniform(ks[3], (4 * H,), jnp.float32, -scale, scale),
        b_hh=jax.random.uniform(ks[4], (4 * H,), jnp.float32, -scale, scale),
        Wc=jax.random.normal(ks[5], (NFAC, H, H), jnp.float32),
        Wm=jax.random.normal(ks[6], (H, VOCAB), jnp.float32),
        Wy=jax.random.normal(ks[7], (H, 1), jnp.float32),
        # init_hidden() draws these randomly each forward; made deterministic here.
        h0=jax.random.normal(ks[8], (BATCH, H), jnp.float32),
        c0=jax.random.normal(ks[9], (BATCH, H), jnp.float32),
    )

    # pack_padded_sequence (enforce_sorted default) expects descending lengths.
    X_lengths = jnp.array([8, 6, 4], dtype=jnp.int32)
    pos = jnp.arange(SEQ)[None, :]
    X_raw = jax.random.randint(ks[10], (BATCH, SEQ), 1, VOCAB)
    X = jnp.where(pos < X_lengths[:, None], X_raw, 0).astype(jnp.int32)
    Xc = jax.random.normal(ks[11], (NFAC, BATCH), jnp.float32)

    prep = prepare_params(params)               # one-time weight prep, off the call path
    out_m, out_y = tutorial_lstm_forward(prep, X, X_lengths, Xc)
    jax.block_until_ready((out_m, out_y))

    ref_m, ref_y = reference_forward(params, X, X_lengths, Xc)
    assert out_m.shape == (1, BATCH, VOCAB) and out_y.shape == (1, BATCH, 1)
    np.testing.assert_allclose(np.asarray(out_m), np.asarray(ref_m), rtol=2e-3, atol=2e-3)
    np.testing.assert_allclose(np.asarray(out_y), np.asarray(ref_y), rtol=2e-3, atol=2e-3)
    print("KERNEL_OK")
</pallas_src>

<mosaic_0001>
module attributes {stable_mosaic.version = 11 : i64} {
  func.func @tutorial_lstm_kernel(%arg0: memref<8x8xi32, #tpu.memory_space<vmem>>, %arg1: memref<3xi32, #tpu.memory_space<smem>>, %arg2: memref<3x3xf32, #tpu.memory_space<smem>>, %arg3: memref<2x8x32xf32, #tpu.memory_space<vmem>>, %arg4: memref<112x128xf32, #tpu.memory_space<vmem>>, %arg5: memref<8x128xf32, #tpu.memory_space<vmem>>) attributes {dimension_semantics = [], scalar_prefetch = 0 : i64, scratch_operands = 0 : i64, tpu.core_type = #tpu.core_type<tc>} {
    %c0 = arith.constant 0 : index
    %c0_0 = arith.constant 0 : index
    %0 = vector.load %arg4[%c0, %c0_0] : memref<112x128xf32, #tpu.memory_space<vmem>>, vector<16x128xf32>
    %c16 = arith.constant 16 : index
    %c0_1 = arith.constant 0 : index
    %1 = vector.load %arg4[%c16, %c0_1] : memref<112x128xf32, #tpu.memory_space<vmem>>, vector<32x128xf32>
    %c48 = arith.constant 48 : index
    %c0_2 = arith.constant 0 : index
    %2 = vector.load %arg4[%c48, %c0_2] : memref<112x128xf32, #tpu.memory_space<vmem>>, vector<32x128xf32>
    %c80 = arith.constant 80 : index
    %c0_3 = arith.constant 0 : index
    %3 = vector.load %arg4[%c80, %c0_3] : memref<112x128xf32, #tpu.memory_space<vmem>>, vector<32x128xf32>
    %c0_4 = arith.constant 0 : index
    %c0_5 = arith.constant 0 : index
    %4 = vector.load %arg0[%c0_4, %c0_5] : memref<8x8xi32, #tpu.memory_space<vmem>>, vector<8x8xi32>
    %5 = vector.shape_cast %4 : vector<8x8xi32> to vector<8x8x1xi32>
    %6 = tpu.iota {dimensions = array<i32: 2>} : vector<8x8x16xi32>
    %7 = vector.broadcast %5 : vector<8x8x1xi32> to vector<8x8x16xi32>
    %8 = arith.cmpi eq, %7, %6 : vector<8x8x16xi32>
    %9 = arith.extui %8 : vector<8x8x16xi1> to vector<8x8x16xi32>
    %10 = arith.sitofp %9 : vector<8x8x16xi32> to vector<8x8x16xf32>
    %11 = vector.shape_cast %10 : vector<8x8x16xf32> to vector<64x16xf32>
    %cst = arith.constant dense<0.000000e+00> : vector<64x128xf32>
    %12 = tpu.matmul %11, %0, %cst {dimension_numbers = #tpu.dot_dimension_numbers<[1], [0], [0], [1], [0, 0, 1, 1], [], []>} : vector<64x16xf32>, vector<16x128xf32>, vector<64x128xf32> -> vector<64x128xf32>
    %13 = vector.shape_cast %12 : vector<64x128xf32> to vector<8x8x128xf32>
    %14 = tpu.iota {dimensions = array<i32: 0>} : vector<8x1xi32>
    %c0_i32 = arith.constant 0 : i32
    %15 = vector.broadcast %c0_i32 : i32 to vector<8x1xi32>
    %c0_i32_6 = arith.constant 0 : i32
    %16 = vector.broadcast %c0_i32_6 : i32 to vector<8x1xi32>
    %17 = arith.cmpi eq, %14, %16 : vector<8x1xi32>
    %c0_7 = arith.constant 0 : index
    %18 = memref.load %arg1[%c0_7] : memref<3xi32, #tpu.memory_space<smem>>
    %19 = vector.broadcast %18 : i32 to vector<8x1xi32>
    %20 = arith.select %17, %19, %15 : vector<8x1xi1>, vector<8x1xi32>
    %c1_i32 = arith.constant 1 : i32
    %21 = vector.broadcast %c1_i32 : i32 to vector<8x1xi32>
    %22 = arith.cmpi eq, %14, %21 : vector<8x1xi32>
    %c1 = arith.constant 1 : index
    %23 = memref.load %arg1[%c1] : memref<3xi32, #tpu.memory_space<smem>>
    %24 = vector.broadcast %23 : i32 to vector<8x1xi32>
    %25 = arith.select %22, %24, %20 : vector<8x1xi1>, vector<8x1xi32>
    %c2_i32 = arith.constant 2 : i32
    %26 = vector.broadcast %c2_i32 : i32 to vector<8x1xi32>
    %27 = arith.cmpi eq, %14, %26 : vector<8x1xi32>
    %c2 = arith.constant 2 : index
    %28 = memref.load %arg1[%c2] : memref<3xi32, #tpu.memory_space<smem>>
    %29 = vector.broadcast %28 : i32 to vector<8x1xi32>
    %30 = arith.select %27, %29, %25 : vector<8x1xi1>, vector<8x1xi32>
    %c0_8 = arith.constant 0 : index
    %c0_9 = arith.constant 0 : index
    %c0_10 = arith.constant 0 : index
    %31 = vector.load %arg3[%c0_8, %c0_9, %c0_10] : memref<2x8x32xf32, #tpu.memory_space<vmem>>, vector<1x8x32xf32>
    %32 = vector.shape_cast %31 : vector<1x8x32xf32> to vector<8x32xf32>
    %c1_11 = arith.constant 1 : index
    %c0_12 = arith.constant 0 : index
    %c0_13 = arith.constant 0 : index
    %33 = vector.load %arg3[%c1_11, %c0_12, %c0_13] : memref<2x8x32xf32, #tpu.memory_space<vmem>>, vector<1x8x32xf32>
    %34 = vector.shape_cast %33 : vector<1x8x32xf32> to vector<8x32xf32>
    %35 = vector.extract_strided_slice %13 {offsets = [0, 0, 0], sizes = [1, 8, 128], strides = [1, 1, 1]} : vector<8x8x128xf32> to vector<1x8x128xf32>
    %36 = vector.shape_cast %35 : vector<1x8x128xf32> to vector<8x128xf32>
    %cst_14 = arith.constant dense<0.000000e+00> : vector<8x128xf32>
    %37 = tpu.matmul %32, %1, %cst_14 {dimension_numbers = #tpu.dot_dimension_numbers<[1], [0], [0], [1], [0, 0, 1, 1], [], []>} : vector<8x32xf32>, vector<32x128xf32>, vector<8x128xf32> -> vector<8x128xf32>
    %38 = arith.addf %36, %37 : vector<8x128xf32>
    %39 = arith.negf %38 : vector<8x128xf32>
    %40 = math.exp %39 : vector<8x128xf32>
    %cst_15 = arith.constant 1.000000e+00 : f32
    %41 = vector.broadcast %cst_15 : f32 to vector<8x128xf32>
    %42 = arith.addf %41, %40 : vector<8x128xf32>
    %43 = arith.divf %41, %42 : vector<8x128xf32>
    %44 = vector.extract_strided_slice %43 {offsets = [0, 0], sizes = [8, 32], strides = [1, 1]} : vector<8x128xf32> to vector<8x32xf32>
    %45 = vector.extract_strided_slice %43 {offsets = [0, 32], sizes = [8, 32], strides = [1, 1]} : vector<8x128xf32> to vector<8x32xf32>
    %46 = vector.extract_strided_slice %43 {offsets = [0, 64], sizes = [8, 32], strides = [1, 1]} : vector<8x128xf32> to vector<8x32xf32>
    %cst_16 = arith.constant 2.000000e+00 : f32
    %47 = vector.broadcast %cst_16 : f32 to vector<8x32xf32>
    %48 = arith.mulf %47, %46 : vector<8x32xf32>
    %cst_17 = arith.constant 1.000000e+00 : f32
    %49 = vector.broadcast %cst_17 : f32 to vector<8x32xf32>
    %50 = arith.subf %48, %49 : vector<8x32xf32>
    %51 = vector.extract_strided_slice %43 {offsets = [0, 96], sizes = [8, 32], strides = [1, 1]} : vector<8x128xf32> to vector<8x32xf32>
    %52 = arith.mulf %45, %34 : vector<8x32xf32>
    %53 = arith.mulf %44, %50 : vector<8x32xf32>
    %54 = arith.addf %52, %53 : vector<8x32xf32>
    %55 = math.tanh %54 : vector<8x32xf32>
    %56 = arith.mulf %51, %55 : vector<8x32xf32>
    %c0_i32_18 = arith.constant 0 : i32
    %57 = vector.broadcast %c0_i32_18 : i32 to vector<8x1xi32>
    %58 = arith.cmpi sgt, %30, %57 : vector<8x1xi32>
    %59 = vector.shape_cast %58 : vector<8x1xi1> to vector<8x1xi1>
    %60 = vector.broadcast %59 : vector<8x1xi1> to vector<8x32xi1>
    %61 = arith.select %60, %56, %32 : vector<8x32xi1>, vector<8x32xf32>
    %62 = vector.shape_cast %58 : vector<8x1xi1> to vector<8x1xi1>
    %63 = vector.broadcast %62 : vector<8x1xi1> to vector<8x32xi1>
    %64 = arith.select %63, %54, %34 : vector<8x32xi1>, vector<8x32xf32>
    %65 = vector.extract_strided_slice %13 {offsets = [1, 0, 0], sizes = [1, 8, 128], strides = [1, 1, 1]} : vector<8x8x128xf32> to vector<1x8x128xf32>
    %66 = vector.shape_cast %65 : vector<1x8x128xf32> to vector<8x128xf32>
    %cst_19 = arith.constant dense<0.000000e+00> : vector<8x128xf32>
    %67 = tpu.matmul %61, %1, %cst_19 {dimension_numbers = #tpu.dot_dimension_numbers<[1], [0], [0], [1], [0, 0, 1, 1], [], []>} : vector<8x32xf32>, vector<32x128xf32>, vector<8x128xf32> -> vector<8x128xf32>
    %68 = arith.addf %66, %67 : vector<8x128xf32>
    %69 = arith.negf %68 : vector<8x128xf32>
    %70 = math.exp %69 : vector<8x128xf32>
    %cst_20 = arith.constant 1.000000e+00 : f32
    %71 = vector.broadcast %cst_20 : f32 to vector<8x128xf32>
    %72 = arith.addf %71, %70 : vector<8x128xf32>
    %73 = arith.divf %71, %72 : vector<8x128xf32>
    %74 = vector.extract_strided_slice %73 {offsets = [0, 0], sizes = [8, 32], strides = [1, 1]} : vector<8x128xf32> to vector<8x32xf32>
    %75 = vector.extract_strided_slice %73 {offsets = [0, 32], sizes = [8, 32], strides = [1, 1]} : vector<8x128xf32> to vector<8x32xf32>
    %76 = vector.extract_strided_slice %73 {offsets = [0, 64], sizes = [8, 32], strides = [1, 1]} : vector<8x128xf32> to vector<8x32xf32>
    %cst_21 = arith.constant 2.000000e+00 : f32
    %77 = vector.broadcast %cst_21 : f32 to vector<8x32xf32>
    %78 = arith.mulf %77, %76 : vector<8x32xf32>
    %cst_22 = arith.constant 1.000000e+00 : f32
    %79 = vector.broadcast %cst_22 : f32 to vector<8x32xf32>
    %80 = arith.subf %78, %79 : vector<8x32xf32>
    %81 = vector.extract_strided_slice %73 {offsets = [0, 96], sizes = [8, 32], strides = [1, 1]} : vector<8x128xf32> to vector<8x32xf32>
    %82 = arith.mulf %75, %64 : vector<8x32xf32>
    %83 = arith.mulf %74, %80 : vector<8x32xf32>
    %84 = arith.addf %82, %83 : vector<8x32xf32>
    %85 = math.tanh %84 : vector<8x32xf32>
    %86 = arith.mulf %81, %85 : vector<8x32xf32>
    %c1_i32_23 = arith.constant 1 : i32
    %87 = vector.broadcast %c1_i32_23 : i32 to vector<8x1xi32>
    %88 = arith.cmpi sgt, %30, %87 : vector<8x1xi32>
    %89 = vector.shape_cast %88 : vector<8x1xi1> to vector<8x1xi1>
    %90 = vector.broadcast %89 : vector<8x1xi1> to vector<8x32xi1>
    %91 = arith.select %90, %86, %61 : vector<8x32xi1>, vector<8x32xf32>
    %92 = vector.shape_cast %88 : vector<8x1xi1> to vector<8x1xi1>
    %93 = vector.broadcast %92 : vector<8x1xi1> to vector<8x32xi1>
    %94 = arith.select %93, %84, %64 : vector<8x32xi1>, vector<8x32xf32>
    %95 = vector.extract_strided_slice %13 {offsets = [2, 0, 0], sizes = [1, 8, 128], strides = [1, 1, 1]} : vector<8x8x128xf32> to vector<1x8x128xf32>
    %96 = vector.shape_cast %95 : vector<1x8x128xf32> to vector<8x128xf32>
    %cst_24 = arith.constant dense<0.000000e+00> : vector<8x128xf32>
    %97 = tpu.matmul %91, %1, %cst_24 {dimension_numbers = #tpu.dot_dimension_numbers<[1], [0], [0], [1], [0, 0, 1, 1], [], []>} : vector<8x32xf32>, vector<32x128xf32>, vector<8x128xf32> -> vector<8x128xf32>
    %98 = arith.addf %96, %97 : vector<8x128xf32>
    %99 = arith.negf %98 : vector<8x128xf32>
    %100 = math.exp %99 : vector<8x128xf32>
    %cst_25 = arith.constant 1.000000e+00 : f32
    %101 = vector.broadcast %cst_25 : f32 to vector<8x128xf32>
    %102 = arith.addf %101, %100 : vector<8x128xf32>
    %103 = arith.divf %101, %102 : vector<8x128xf32>
    %104 = vector.extract_strided_slice %103 {offsets = [0, 0], sizes = [8, 32], strides = [1, 1]} : vector<8x128xf32> to vector<8x32xf32>
    %105 = vector.extract_strided_slice %103 {offsets = [0, 32], sizes = [8, 32], strides = [1, 1]} : vector<8x128xf32> to vector<8x32xf32>
    %106 = vector.extract_strided_slice %103 {offsets = [0, 64], sizes = [8, 32], strides = [1, 1]} : vector<8x128xf32> to vector<8x32xf32>
    %cst_26 = arith.constant 2.000000e+00 : f32
    %107 = vector.broadcast %cst_26 : f32 to vector<8x32xf32>
    %108 = arith.mulf %107, %106 : vector<8x32xf32>
    %cst_27 = arith.constant 1.000000e+00 : f32
    %109 = vector.broadcast %cst_27 : f32 to vector<8x32xf32>
    %110 = arith.subf %108, %109 : vector<8x32xf32>
    %111 = vector.extract_strided_slice %103 {offsets = [0, 96], sizes = [8, 32], strides = [1, 1]} : vector<8x128xf32> to vector<8x32xf32>
    %112 = arith.mulf %105, %94 : vector<8x32xf32>
    %113 = arith.mulf %104, %110 : vector<8x32xf32>
    %114 = arith.addf %112, %113 : vector<8x32xf32>
    %115 = math.tanh %114 : vector<8x32xf32>
    %116 = arith.mulf %111, %115 : vector<8x32xf32>
    %c2_i32_28 = arith.constant 2 : i32
    %117 = vector.broadcast %c2_i32_28 : i32 to vector<8x1xi32>
    %118 = arith.cmpi sgt, %30, %117 : vector<8x1xi32>
    %119 = vector.shape_cast %118 : vector<8x1xi1> to vector<8x1xi1>
    %120 = vector.broadcast %119 : vector<8x1xi1> to vector<8x32xi1>
    %121 = arith.select %120, %116, %91 : vector<8x32xi1>, vector<8x32xf32>
    %122 = vector.shape_cast %118 : vector<8x1xi1> to vector<8x1xi1>
    %123 = vector.broadcast %122 : vector<8x1xi1> to vector<8x32xi1>
    %124 = arith.select %123, %114, %94 : vector<8x32xi1>, vector<8x32xf32>
    %125 = vector.extract_strided_slice %13 {offsets = [3, 0, 0], sizes = [1, 8, 128], strides = [1, 1, 1]} : vector<8x8x128xf32> to vector<1x8x128xf32>
    %126 = vector.shape_cast %125 : vector<1x8x128xf32> to vector<8x128xf32>
    %cst_29 = arith.constant dense<0.000000e+00> : vector<8x128xf32>
    %127 = tpu.matmul %121, %1, %cst_29 {dimension_numbers = #tpu.dot_dimension_numbers<[1], [0], [0], [1], [0, 0, 1, 1], [], []>} : vector<8x32xf32>, vector<32x128xf32>, vector<8x128xf32> -> vector<8x128xf32>
    %128 = arith.addf %126, %127 : vector<8x128xf32>
    %129 = arith.negf %128 : vector<8x128xf32>
    %130 = math.exp %129 : vector<8x128xf32>
    %cst_30 = arith.constant 1.000000e+00 : f32
    %131 = vector.broadcast %cst_30 : f32 to vector<8x128xf32>
    %132 = arith.addf %131, %130 : vector<8x128xf32>
    %133 = arith.divf %131, %132 : vector<8x128xf32>
    %134 = vector.extract_strided_slice %133 {offsets = [0, 0], sizes = [8, 32], strides = [1, 1]} : vector<8x128xf32> to vector<8x32xf32>
    %135 = vector.extract_strided_slice %133 {offsets = [0, 32], sizes = [8, 32], strides = [1, 1]} : vector<8x128xf32> to vector<8x32xf32>
    %136 = vector.extract_strided_slice %133 {offsets = [0, 64], sizes = [8, 32], strides = [1, 1]} : vector<8x128xf32> to vector<8x32xf32>
    %cst_31 = arith.constant 2.000000e+00 : f32
    %137 = vector.broadcast %cst_31 : f32 to vector<8x32xf32>
    %138 = arith.mulf %137, %136 : vector<8x32xf32>
    %cst_32 = arith.constant 1.000000e+00 : f32
    %139 = vector.broadcast %cst_32 : f32 to vector<8x32xf32>
    %140 = arith.subf %138, %139 : vector<8x32xf32>
    %141 = vector.extract_strided_slice %133 {offsets = [0, 96], sizes = [8, 32], strides = [1, 1]} : vector<8x128xf32> to vector<8x32xf32>
    %142 = arith.mulf %135, %124 : vector<8x32xf32>
    %143 = arith.mulf %134, %140 : vector<8x32xf32>
    %144 = arith.addf %142, %143 : vector<8x32xf32>
    %145 = math.tanh %144 : vector<8x32xf32>
    %146 = arith.mulf %141, %145 : vector<8x32xf32>
    %c3_i32 = arith.constant 3 : i32
    %147 = vector.broadcast %c3_i32 : i32 to vector<8x1xi32>
    %148 = arith.cmpi sgt, %30, %147 : vector<8x1xi32>
    %149 = vector.shape_cast %148 : vector<8x1xi1> to vector<8x1xi1>
    %150 = vector.broadcast %149 : vector<8x1xi1> to vector<8x32xi1>
    %151 = arith.select %150, %146, %121 : vector<8x32xi1>, vector<8x32xf32>
    %152 = vector.shape_cast %148 : vector<8x1xi1> to vector<8x1xi1>
    %153 = vector.broadcast %152 : vector<8x1xi1> to vector<8x32xi1>
    %154 = arith.select %153, %144, %124 : vector<8x32xi1>, vector<8x32xf32>
    %155 = vector.extract_strided_slice %13 {offsets = [4, 0, 0], sizes = [1, 8, 128], strides = [1, 1, 1]} : vector<8x8x128xf32> to vector<1x8x128xf32>
    %156 = vector.shape_cast %155 : vector<1x8x128xf32> to vector<8x128xf32>
    %cst_33 = arith.constant dense<0.000000e+00> : vector<8x128xf32>
    %157 = tpu.matmul %151, %1, %cst_33 {dimension_numbers = #tpu.dot_dimension_numbers<[1], [0], [0], [1], [0, 0, 1, 1], [], []>} : vector<8x32xf32>, vector<32x128xf32>, vector<8x128xf32> -> vector<8x128xf32>
    %158 = arith.addf %156, %157 : vector<8x128xf32>
    %159 = arith.negf %158 : vector<8x128xf32>
    %160 = math.exp %159 : vector<8x128xf32>
    %cst_34 = arith.constant 1.000000e+00 : f32
    %161 = vector.broadcast %cst_34 : f32 to vector<8x128xf32>
    %162 = arith.addf %161, %160 : vector<8x128xf32>
    %163 = arith.divf %161, %162 : vector<8x128xf32>
    %164 = vector.extract_strided_slice %163 {offsets = [0, 0], sizes = [8, 32], strides = [1, 1]} : vector<8x128xf32> to vector<8x32xf32>
    %165 = vector.extract_strided_slice %163 {offsets = [0, 32], sizes = [8, 32], strides = [1, 1]} : vector<8x128xf32> to vector<8x32xf32>
    %166 = vector.extract_strided_slice %163 {offsets = [0, 64], sizes = [8, 32], strides = [1, 1]} : vector<8x128xf32> to vector<8x32xf32>
    %cst_35 = arith.constant 2.000000e+00 : f32
    %167 = vector.broadcast %cst_35 : f32 to vector<8x32xf32>
    %168 = arith.mulf %167, %166 : vector<8x32xf32>
    %cst_36 = arith.constant 1.000000e+00 : f32
    %169 = vector.broadcast %cst_36 : f32 to vector<8x32xf32>
    %170 = arith.subf %168, %169 : vector<8x32xf32>
    %171 = vector.extract_strided_slice %163 {offsets = [0, 96], sizes = [8, 32], strides = [1, 1]} : vector<8x128xf32> to vector<8x32xf32>
    %172 = arith.mulf %165, %154 : vector<8x32xf32>
    %173 = arith.mulf %164, %170 : vector<8x32xf32>
    %174 = arith.addf %172, %173 : vector<8x32xf32>
    %175 = math.tanh %174 : vector<8x32xf32>
    %176 = arith.mulf %171, %175 : vector<8x32xf32>
    %c4_i32 = arith.constant 4 : i32
    %177 = vector.broadcast %c4_i32 : i32 to vector<8x1xi32>
    %178 = arith.cmpi sgt, %30, %177 : vector<8x1xi32>
    %179 = vector.shape_cast %178 : vector<8x1xi1> to vector<8x1xi1>
    %180 = vector.broadcast %179 : vector<8x1xi1> to vector<8x32xi1>
    %181 = arith.select %180, %176, %151 : vector<8x32xi1>, vector<8x32xf32>
    %182 = vector.shape_cast %178 : vector<8x1xi1> to vector<8x1xi1>
    %183 = vector.broadcast %182 : vector<8x1xi1> to vector<8x32xi1>
    %184 = arith.select %183, %174, %154 : vector<8x32xi1>, vector<8x32xf32>
    %185 = vector.extract_strided_slice %13 {offsets = [5, 0, 0], sizes = [1, 8, 128], strides = [1, 1, 1]} : vector<8x8x128xf32> to vector<1x8x128xf32>
    %186 = vector.shape_cast %185 : vector<1x8x128xf32> to vector<8x128xf32>
    %cst_37 = arith.constant dense<0.000000e+00> : vector<8x128xf32>
    %187 = tpu.matmul %181, %1, %cst_37 {dimension_numbers = #tpu.dot_dimension_numbers<[1], [0], [0], [1], [0, 0, 1, 1], [], []>} : vector<8x32xf32>, vector<32x128xf32>, vector<8x128xf32> -> vector<8x128xf32>
    %188 = arith.addf %186, %187 : vector<8x128xf32>
    %189 = arith.negf %188 : vector<8x128xf32>
    %190 = math.exp %189 : vector<8x128xf32>
    %cst_38 = arith.constant 1.000000e+00 : f32
    %191 = vector.broadcast %cst_38 : f32 to vector<8x128xf32>
    %192 = arith.addf %191, %190 : vector<8x128xf32>
    %193 = arith.divf %191, %192 : vector<8x128xf32>
    %194 = vector.extract_strided_slice %193 {offsets = [0, 0], sizes = [8, 32], strides = [1, 1]} : vector<8x128xf32> to vector<8x32xf32>
    %195 = vector.extract_strided_slice %193 {offsets = [0, 32], sizes = [8, 32], strides = [1, 1]} : vector<8x128xf32> to vector<8x32xf32>
    %196 = vector.extract_strided_slice %193 {offsets = [0, 64], sizes = [8, 32], strides = [1, 1]} : vector<8x128xf32> to vector<8x32xf32>
    %cst_39 = arith.constant 2.000000e+00 : f32
    %197 = vector.broadcast %cst_39 : f32 to vector<8x32xf32>
    %198 = arith.mulf %197, %196 : vector<8x32xf32>
    %cst_40 = arith.constant 1.000000e+00 : f32
    %199 = vector.broadcast %cst_40 : f32 to vector<8x32xf32>
    %200 = arith.subf %198, %199 : vector<8x32xf32>
    %201 = vector.extract_strided_slice %193 {offsets = [0, 96], sizes = [8, 32], strides = [1, 1]} : vector<8x128xf32> to vector<8x32xf32>
    %202 = arith.mulf %195, %184 : vector<8x32xf32>
    %203 = arith.mulf %194, %200 : vector<8x32xf32>
    %204 = arith.addf %202, %203 : vector<8x32xf32>
    %205 = math.tanh %204 : vector<8x32xf32>
    %206 = arith.mulf %201, %205 : vector<8x32xf32>
    %c5_i32 = arith.constant 5 : i32
    %207 = vector.broadcast %c5_i32 : i32 to vector<8x1xi32>
    %208 = arith.cmpi sgt, %30, %207 : vector<8x1xi32>
    %209 = vector.shape_cast %208 : vector<8x1xi1> to vector<8x1xi1>
    %210 = vector.broadcast %209 : vector<8x1xi1> to vector<8x32xi1>
    %211 = arith.select %210, %206, %181 : vector<8x32xi1>, vector<8x32xf32>
    %212 = vector.shape_cast %208 : vector<8x1xi1> to vector<8x1xi1>
    %213 = vector.broadcast %212 : vector<8x1xi1> to vector<8x32xi1>
    %214 = arith.select %213, %204, %184 : vector<8x32xi1>, vector<8x32xf32>
    %215 = vector.extract_strided_slice %13 {offsets = [6, 0, 0], sizes = [1, 8, 128], strides = [1, 1, 1]} : vector<8x8x128xf32> to vector<1x8x128xf32>
    %216 = vector.shape_cast %215 : vector<1x8x128xf32> to vector<8x128xf32>
    %cst_41 = arith.constant dense<0.000000e+00> : vector<8x128xf32>
    %217 = tpu.matmul %211, %1, %cst_41 {dimension_numbers = #tpu.dot_dimension_numbers<[1], [0], [0], [1], [0, 0, 1, 1], [], []>} : vector<8x32xf32>, vector<32x128xf32>, vector<8x128xf32> -> vector<8x128xf32>
    %218 = arith.addf %216, %217 : vector<8x128xf32>
    %219 = arith.negf %218 : vector<8x128xf32>
    %220 = math.exp %219 : vector<8x128xf32>
    %cst_42 = arith.constant 1.000000e+00 : f32
    %221 = vector.broadcast %cst_42 : f32 to vector<8x128xf32>
    %222 = arith.addf %221, %220 : vector<8x128xf32>
    %223 = arith.divf %221, %222 : vector<8x128xf32>
    %224 = vector.extract_strided_slice %223 {offsets = [0, 0], sizes = [8, 32], strides = [1, 1]} : vector<8x128xf32> to vector<8x32xf32>
    %225 = vector.extract_strided_slice %223 {offsets = [0, 32], sizes = [8, 32], strides = [1, 1]} : vector<8x128xf32> to vector<8x32xf32>
    %226 = vector.extract_strided_slice %223 {offsets = [0, 64], sizes = [8, 32], strides = [1, 1]} : vector<8x128xf32> to vector<8x32xf32>
    %cst_43 = arith.constant 2.000000e+00 : f32
    %227 = vector.broadcast %cst_43 : f32 to vector<8x32xf32>
    %228 = arith.mulf %227, %226 : vector<8x32xf32>
    %cst_44 = arith.constant 1.000000e+00 : f32
    %229 = vector.broadcast %cst_44 : f32 to vector<8x32xf32>
    %230 = arith.subf %228, %229 : vector<8x32xf32>
    %231 = vector.extract_strided_slice %223 {offsets = [0, 96], sizes = [8, 32], strides = [1, 1]} : vector<8x128xf32> to vector<8x32xf32>
    %232 = arith.mulf %225, %214 : vector<8x32xf32>
    %233 = arith.mulf %224, %230 : vector<8x32xf32>
    %234 = arith.addf %232, %233 : vector<8x32xf32>
    %235 = math.tanh %234 : vector<8x32xf32>
    %236 = arith.mulf %231, %235 : vector<8x32xf32>
    %c6_i32 = arith.constant 6 : i32
    %237 = vector.broadcast %c6_i32 : i32 to vector<8x1xi32>
    %238 = arith.cmpi sgt, %30, %237 : vector<8x1xi32>
    %239 = vector.shape_cast %238 : vector<8x1xi1> to vector<8x1xi1>
    %240 = vector.broadcast %239 : vector<8x1xi1> to vector<8x32xi1>
    %241 = arith.select %240, %236, %211 : vector<8x32xi1>, vector<8x32xf32>
    %242 = vector.shape_cast %238 : vector<8x1xi1> to vector<8x1xi1>
    %243 = vector.broadcast %242 : vector<8x1xi1> to vector<8x32xi1>
    %244 = arith.select %243, %234, %214 : vector<8x32xi1>, vector<8x32xf32>
    %245 = vector.extract_strided_slice %13 {offsets = [7, 0, 0], sizes = [1, 8, 128], strides = [1, 1, 1]} : vector<8x8x128xf32> to vector<1x8x128xf32>
    %246 = vector.shape_cast %245 : vector<1x8x128xf32> to vector<8x128xf32>
    %cst_45 = arith.constant dense<0.000000e+00> : vector<8x128xf32>
    %247 = tpu.matmul %241, %1, %cst_45 {dimension_numbers = #tpu.dot_dimension_numbers<[1], [0], [0], [1], [0, 0, 1, 1], [], []>} : vector<8x32xf32>, vector<32x128xf32>, vector<8x128xf32> -> vector<8x128xf32>
    %248 = arith.addf %246, %247 : vector<8x128xf32>
    %249 = arith.negf %248 : vector<8x128xf32>
    %250 = math.exp %249 : vector<8x128xf32>
    %cst_46 = arith.constant 1.000000e+00 : f32
    %251 = vector.broadcast %cst_46 : f32 to vector<8x128xf32>
    %252 = arith.addf %251, %250 : vector<8x128xf32>
    %253 = arith.divf %251, %252 : vector<8x128xf32>
    %254 = vector.extract_strided_slice %253 {offsets = [0, 0], sizes = [8, 32], strides = [1, 1]} : vector<8x128xf32> to vector<8x32xf32>
    %255 = vector.extract_strided_slice %253 {offsets = [0, 32], sizes = [8, 32], strides = [1, 1]} : vector<8x128xf32> to vector<8x32xf32>
    %256 = vector.extract_strided_slice %253 {offsets = [0, 64], sizes = [8, 32], strides = [1, 1]} : vector<8x128xf32> to vector<8x32xf32>
    %cst_47 = arith.constant 2.000000e+00 : f32
    %257 = vector.broadcast %cst_47 : f32 to vector<8x32xf32>
    %258 = arith.mulf %257, %256 : vector<8x32xf32>
    %cst_48 = arith.constant 1.000000e+00 : f32
    %259 = vector.broadcast %cst_48 : f32 to vector<8x32xf32>
    %260 = arith.subf %258, %259 : vector<8x32xf32>
    %261 = vector.extract_strided_slice %253 {offsets = [0, 96], sizes = [8, 32], strides = [1, 1]} : vector<8x128xf32> to vector<8x32xf32>
    %262 = arith.mulf %255, %244 : vector<8x32xf32>
    %263 = arith.mulf %254, %260 : vector<8x32xf32>
    %264 = arith.addf %262, %263 : vector<8x32xf32>
    %265 = math.tanh %264 : vector<8x32xf32>
    %266 = arith.mulf %261, %265 : vector<8x32xf32>
    %c7_i32 = arith.constant 7 : i32
    %267 = vector.broadcast %c7_i32 : i32 to vector<8x1xi32>
    %268 = arith.cmpi sgt, %30, %267 : vector<8x1xi32>
    %269 = vector.shape_cast %268 : vector<8x1xi1> to vector<8x1xi1>
    %270 = vector.broadcast %269 : vector<8x1xi1> to vector<8x32xi1>
    %271 = arith.select %270, %266, %241 : vector<8x32xi1>, vector<8x32xf32>
    %cst_49 = arith.constant dense<0.000000e+00> : vector<8x128xf32>
    %272 = tpu.matmul %271, %2, %cst_49 {dimension_numbers = #tpu.dot_dimension_numbers<[1], [0], [0], [1], [0, 0, 1, 1], [], []>} : vector<8x32xf32>, vector<32x128xf32>, vector<8x128xf32> -> vector<8x128xf32>
    %c0_i32_50 = arith.constant 0 : i32
    %273 = vector.broadcast %c0_i32_50 : i32 to vector<8x1xi32>
    %c0_51 = arith.constant 0 : index
    %c0_52 = arith.constant 0 : index
    %274 = memref.load %arg2[%c0_51, %c0_52] : memref<3x3xf32, #tpu.memory_space<smem>>
    %c1_53 = arith.constant 1 : index
    %c0_54 = arith.constant 0 : index
    %275 = memref.load %arg2[%c1_53, %c0_54] : memref<3x3xf32, #tpu.memory_space<smem>>
    %276 = arith.cmpf ogt, %275, %274 : f32
    %c1_55 = arith.constant 1 : index
    %c0_56 = arith.constant 0 : index
    %277 = memref.load %arg2[%c1_55, %c0_56] : memref<3x3xf32, #tpu.memory_space<smem>>
    %278 = arith.select %276, %277, %274 : f32
    %c1_i32_57 = arith.constant 1 : i32
    %c0_i32_58 = arith.constant 0 : i32
    %279 = arith.select %276, %c1_i32_57, %c0_i32_58 : i32
    %c2_59 = arith.constant 2 : index
    %c0_60 = arith.constant 0 : index
    %280 = memref.load %arg2[%c2_59, %c0_60] : memref<3x3xf32, #tpu.memory_space<smem>>
    %281 = arith.cmpf ogt, %280, %278 : f32
    %c2_i32_61 = arith.constant 2 : i32
    %282 = arith.select %281, %c2_i32_61, %279 : i32
    %c0_i32_62 = arith.constant 0 : i32
    %283 = vector.broadcast %c0_i32_62 : i32 to vector<8x1xi32>
    %284 = arith.cmpi eq, %14, %283 : vector<8x1xi32>
    %285 = vector.broadcast %282 : i32 to vector<8x1xi32>
    %286 = arith.select %284, %285, %273 : vector<8x1xi1>, vector<8x1xi32>
    %c0_63 = arith.constant 0 : index
    %c1_64 = arith.constant 1 : index
    %287 = memref.load %arg2[%c0_63, %c1_64] : memref<3x3xf32, #tpu.memory_space<smem>>
    %c1_65 = arith.constant 1 : index
    %c1_66 = arith.constant 1 : index
    %288 = memref.load %arg2[%c1_65, %c1_66] : memref<3x3xf32, #tpu.memory_space<smem>>
    %289 = arith.cmpf ogt, %288, %287 : f32
    %c1_67 = arith.constant 1 : index
    %c1_68 = arith.constant 1 : index
    %290 = memref.load %arg2[%c1_67, %c1_68] : memref<3x3xf32, #tpu.memory_space<smem>>
    %291 = arith.select %289, %290, %287 : f32
    %c1_i32_69 = arith.constant 1 : i32
    %c0_i32_70 = arith.constant 0 : i32
    %292 = arith.select %289, %c1_i32_69, %c0_i32_70 : i32
    %c2_71 = arith.constant 2 : index
    %c1_72 = arith.constant 1 : index
    %293 = memref.load %arg2[%c2_71, %c1_72] : memref<3x3xf32, #tpu.memory_space<smem>>
    %294 = arith.cmpf ogt, %293, %291 : f32
    %c2_i32_73 = arith.constant 2 : i32
    %295 = arith.select %294, %c2_i32_73, %292 : i32
    %c1_i32_74 = arith.constant 1 : i32
    %296 = vector.broadcast %c1_i32_74 : i32 to vector<8x1xi32>
    %297 = arith.cmpi eq, %14, %296 : vector<8x1xi32>
    %298 = vector.broadcast %295 : i32 to vector<8x1xi32>
    %299 = arith.select %297, %298, %286 : vector<8x1xi1>, vector<8x1xi32>
    %c0_75 = arith.constant 0 : index
    %c2_76 = arith.constant 2 : index
    %300 = memref.load %arg2[%c0_75, %c2_76] : memref<3x3xf32, #tpu.memory_space<smem>>
    %c1_77 = arith.constant 1 : index
    %c2_78 = arith.constant 2 : index
    %301 = memref.load %arg2[%c1_77, %c2_78] : memref<3x3xf32, #tpu.memory_space<smem>>
    %302 = arith.cmpf ogt, %301, %300 : f32
    %c1_79 = arith.constant 1 : index
    %c2_80 = arith.constant 2 : index
    %303 = memref.load %arg2[%c1_79, %c2_80] : memref<3x3xf32, #tpu.memory_space<smem>>
    %304 = arith.select %302, %303, %300 : f32
    %c1_i32_81 = arith.constant 1 : i32
    %c0_i32_82 = arith.constant 0 : i32
    %305 = arith.select %302, %c1_i32_81, %c0_i32_82 : i32
    %c2_83 = arith.constant 2 : index
    %c2_84 = arith.constant 2 : index
    %306 = memref.load %arg2[%c2_83, %c2_84] : memref<3x3xf32, #tpu.memory_space<smem>>
    %307 = arith.cmpf ogt, %306, %304 : f32
    %c2_i32_85 = arith.constant 2 : i32
    %308 = arith.select %307, %c2_i32_85, %305 : i32
    %c2_i32_86 = arith.constant 2 : i32
    %309 = vector.broadcast %c2_i32_86 : i32 to vector<8x1xi32>
    %310 = arith.cmpi eq, %14, %309 : vector<8x1xi32>
    %311 = vector.broadcast %308 : i32 to vector<8x1xi32>
    %312 = arith.select %310, %311, %299 : vector<8x1xi1>, vector<8x1xi32>
    %cst_87 = arith.constant 0.000000e+00 : f32
    %313 = vector.broadcast %cst_87 : f32 to vector<8x32xf32>
    %c0_i32_88 = arith.constant 0 : i32
    %314 = vector.broadcast %c0_i32_88 : i32 to vector<8x1xi32>
    %315 = arith.cmpi eq, %312, %314 : vector<8x1xi32>
    %316 = vector.extract_strided_slice %272 {offsets = [0, 0], sizes = [8, 32], strides = [1, 1]} : vector<8x128xf32> to vector<8x32xf32>
    %cst_89 = arith.constant 0.000000e+00 : f32
    %317 = vector.shape_cast %315 : vector<8x1xi1> to vector<8x1xi1>
    %318 = vector.broadcast %317 : vector<8x1xi1> to vector<8x32xi1>
    %319 = vector.broadcast %cst_89 : f32 to vector<8x32xf32>
    %320 = arith.select %318, %316, %319 : vector<8x32xi1>, vector<8x32xf32>
    %321 = arith.addf %313, %320 : vector<8x32xf32>
    %c1_i32_90 = arith.constant 1 : i32
    %322 = vector.broadcast %c1_i32_90 : i32 to vector<8x1xi32>
    %323 = arith.cmpi eq, %312, %322 : vector<8x1xi32>
    %324 = vector.extract_strided_slice %272 {offsets = [0, 32], sizes = [8, 32], strides = [1, 1]} : vector<8x128xf32> to vector<8x32xf32>
    %cst_91 = arith.constant 0.000000e+00 : f32
    %325 = vector.shape_cast %323 : vector<8x1xi1> to vector<8x1xi1>
    %326 = vector.broadcast %325 : vector<8x1xi1> to vector<8x32xi1>
    %327 = vector.broadcast %cst_91 : f32 to vector<8x32xf32>
    %328 = arith.select %326, %324, %327 : vector<8x32xi1>, vector<8x32xf32>
    %329 = arith.addf %321, %328 : vector<8x32xf32>
    %c2_i32_92 = arith.constant 2 : i32
    %330 = vector.broadcast %c2_i32_92 : i32 to vector<8x1xi32>
    %331 = arith.cmpi eq, %312, %330 : vector<8x1xi32>
    %332 = vector.extract_strided_slice %272 {offsets = [0, 64], sizes = [8, 32], strides = [1, 1]} : vector<8x128xf32> to vector<8x32xf32>
    %cst_93 = arith.constant 0.000000e+00 : f32
    %333 = vector.shape_cast %331 : vector<8x1xi1> to vector<8x1xi1>
    %334 = vector.broadcast %333 : vector<8x1xi1> to vector<8x32xi1>
    %335 = vector.broadcast %cst_93 : f32 to vector<8x32xf32>
    %336 = arith.select %334, %332, %335 : vector<8x32xi1>, vector<8x32xf32>
    %337 = arith.addf %329, %336 : vector<8x32xf32>
    %338 = arith.addf %271, %337 : vector<8x32xf32>
    %cst_94 = arith.constant dense<0.000000e+00> : vector<8x128xf32>
    %339 = tpu.matmul %338, %3, %cst_94 {dimension_numbers = #tpu.dot_dimension_numbers<[1], [0], [0], [1], [0, 0, 1, 1], [], []>} : vector<8x32xf32>, vector<32x128xf32>, vector<8x128xf32> -> vector<8x128xf32>
    %c0_95 = arith.constant 0 : index
    %c0_96 = arith.constant 0 : index
    %340 = vector.load %arg5[%c0_95, %c0_96] : memref<8x128xf32, #tpu.memory_space<vmem>>, vector<8x128xf32>
    tpu.vector_store %arg5[%c0_95, %c0_96], %339 {strides = array<i32>} : memref<8x128xf32, #tpu.memory_space<vmem>>, vector<8x128xf32>,
    return
  }
}

</mosaic_0001>

<bundles_post_ra>
// kernel: tutorial_lstm_forward.1
= control target key start
LH: loop header
LB: loop body
LE: loop exit
PB: predicated region body
PF: predicated region fallthrough
CT: control target
= control target key end

     0   :  { %10 = vsyncpa [#allocation4], 0  ;;  %s1352_s0 = inlined_call_operand.vmem [shape: s32[8,8], index: 0, kind: input, shape index: {}]   ;;  %s1353_s1 = inlined_call_operand.vmem [shape: s32[3], index: 1, kind: input, shape index: {}]   ;;  %s1354_s2 = inlined_call_operand.vmem [shape: f32[3,3], index: 2, kind: input, shape index: {}]   ;;  %s1355_s3 = inlined_call_operand.vmem [shape: f32[2,8,32], index: 3, kind: input, shape index: {}]   ;;  %s1356_s4 = inlined_call_operand.hbm [shape: f32[112,128], index: 4, kind: input, shape index: {}]   ;;  %s1357_s5 = inlined_call_operand.vmem [shape: f32[8,128], index: 5, kind: output, shape index: {}]  }
   0x1   :  { %11 = vsyncpa [#allocation6], 0  ;;  %s20_s20 = sshll.u32 %s1353_s1, 4  ;;  %s21_s20 = int_to_ptr.vmem [resolvable:$true] %s20_s20 }
   0x2   :  { %12 = vsyncpa [#allocation3], 0  ;;  %s29_s23 = sshll.u32 %s1354_s2, 4  ;;  %s1085_s24 = smov [#allocation2]   ;;  %s30_s23 = int_to_ptr.vmem [resolvable:$true] %s29_s23 }
   0x3   :  { %23 = dma.vmem_to_smem %s21_s20, 16, %s1085_s24, [#allocation4]  }
   0x4   :  { %s1086_s25 = smov [#allocation5]   ;;  %s39_s28 = sshll.u32 %s1356_s4, 4  ;;  %s40_s28 = int_to_ptr.hbm [resolvable:$true] %s39_s28 }
   0x5   :  { %32 = dma.vmem_to_smem %s30_s23, 64, %s1086_s25, [#allocation6]  }
   0x6   :  { %s1087_s29 = smov [#allocation7]   ;;  %s1088_s1 = smov 128  }
   0x7   :  { %s41_s30 = sshll.u32 %s1087_s29, 4  ;;  %s1089_s6 = smov 8   ;;  %s42_s30 = int_to_ptr.vmem [resolvable:$true] %s41_s30 }
   0x8   :  { %47 = dma.hbm_to_vmem [thread:$0]  %s40_s28, 1792, %s42_s30, [#allocation3], %s1088_s1, %s1088_s1, %s1089_s6  }
   0x9   :  { %1079 = dma.done.wait [#allocation4], 16  }
   0xa   :  { %1080 = vsyncadd [#allocation4], 4294967280 }
   0xb   :  { %1081 = dma.done.wait [#allocation6], 64  }
   0xc   :  { %1082 = vsyncadd [#allocation6], 4294967232 }
   0xd   :  { %1083 = dma.done.wait [#allocation3], 1792  }
   0xe   :  { %1084 = vsyncadd [#allocation3], 4294965504 }
   0xf   :  { %60 = sfence }
  0x10   :  { %v77_v0 = vlaneseq  ;;  %v1133_v1 = vld [vmem:[#allocation7 + $0x28] sm:$0xff]  ;;  %v1135_v2 = vld [vmem:[#allocation7 + $0x20] sm:$0xff]  ;;  %v1150_v7 = vld [vmem:[#allocation7 + $0x18] sm:$0xff]  ;;  %vm241_vm0 = vcmask 261120   ;;  %s1090_s10 = smov 32   ;;  %vm158_vm1 = vcmask 130048  }
  0x11   :  { %257 = vmatpush.msra.mxu1 %v1133_v1  ;;  %v1146_v4 = vld [vmem:[%s1352_s0] sm:$0xff]  ;;  %v62_v6 = vld [vmem:[#allocation7 + $0x8] sm:$0xff]  ;;  %v1153_v9 = vld [vmem:[#allocation7 + $0x10] sm:$0xff]  ;;  %v1091_v14 = vmov 0.0   ;;  %s1093_s11 = smov 96   ;;  %s227_s12 = sld [smem:[#allocation2]] }
  0x12   :  { %v1138_v3 = vshrl.u32 %v77_v0, 7  ;;  %v76_v5 = vperm.slane %v1146_v4, 0  ;;  %197 = vmatpush.msra.mxu0 %v62_v6  ;;  %v61_v8 = vld [vmem:[#allocation7] sm:$0xff]  ;;  %967 = vmatpush.msra.mxu2 %v62_v6  ;;  %v932_v11 = vld [vmem:[%s1355_s3 + $0x8] sm:$0xff]  ;;  %v1183_v12 = vand.u32 127, %v77_v0  ;;  %v111_v34 = vperm.slane %v1146_v4, 5 }
  0x13   :  { %258 = vmatpush.msra.mxu1 %v1135_v2  ;;  %968 = vmatpush.msra.mxu3 %v62_v6  ;;  %v1159_v10 = vld [vmem:[%s1355_s3] sm:$0xff]  ;;  %s1092_s3 = smov 64   ;;  %v83_v44 = vperm.slane %v1146_v4, 1  ;;  %s930_s13 = sld [smem:[#allocation2 + $0x1]] }
  0x14   :  { %980 = vset.pattern.permute.xlu0 %v1138_v3  ;;  %981 = vset.pattern.permute.xlu2 %v1138_v3  ;;  %s931_s14 = sld [smem:[#allocation2 + $0x2]]  ;;  %vm226_vm8 = vcmp.eq.s32.totalorder %v1138_v3, 0  ;;  %vm230_vm9 = vcmp.eq.s32.totalorder %v1138_v3, 1  ;;  %vm234_vm10 = vcmp.eq.s32.totalorder %v1138_v3, 2 }
  0x15   :  { %982 = vset.pattern.permute.xlu1 %v1138_v3  ;;  %259 = vmatpush.msra.mxu1 %v1150_v7  ;;  %s823_s15 = sld [smem:[#allocation5]]  ;;  %v73_v3 = vld [vmem:[#allocation7 + $0x60] sm:$0xff] }
  0x16   :  { %198 = vmatpush.msra.mxu0 %v61_v8  ;;  %969 = vmatpush.msra.mxu2 %v61_v8  ;;  %s958_s16 = sld [smem:[#allocation5 + $0x80]] }
  0x17   :  { %260 = vmatpush.msra.mxu1 %v1153_v9  ;;  %288 = vrot.lane.b32.xlu1 %v932_v11, %s1090_s10  ;;  %v228_v45 = vstv %s227_s12  ;;  %s960_s17 = sld [smem:[#allocation5 + $0x1]] }
  0x18   :  { %933 = vmatmul.msk.f32.vlgmr.msra.gmra.mxu1 %vm241_vm0, %v1159_v10  ;;  %333 = vmatpush.msrb.mxu2 %v1133_v1  ;;  %v229_v46 = vsel %vm226_vm8, %v228_v45, 0  ;;  %s961_s18 = sld [smem:[#allocation5 + $0x81]] }
  0x19   :  { %970 = vmatpush.msra.mxu3 %v61_v8  ;;  %471 = vmatpush.msrb.mxu1 %v1133_v1  ;;  %v232_v47 = vstv %s930_s13  ;;  %s963_s19 = sld [smem:[#allocation5 + $0x2]] }
  0x1a   :  { %334 = vmatpush.msrb.mxu2 %v1135_v2  ;;  %v233_v49 = vsel %vm230_vm9, %v232_v47, %v229_v46  ;;  %v236_v50 = vstv %s931_s14  ;;  %s964_s20 = sld [smem:[#allocation5 + $0x82]] }
  0x1b   :  { %402 = vmatpush.msrb.mxu3 %v1133_v1  ;;  %472 = vmatpush.msrb.mxu1 %v1135_v2  ;;  %v1217_v51 = vsel %vm234_vm10, %v236_v50, %v233_v49  ;;  %s959_s21 = sld [smem:[#allocation5 + $0x100]] }
  0x1c   :  { %81 = vperm.xlu0 %980, %v76_v5   ;;  %335 = vmatpush.msrb.mxu2 %v1150_v7  ;;  %vm308_vm11 = vcmp.gt.s32.totalorder %v1217_v51, 0  ;;  %p825_p0 = scmp.gt.f32.partialorder %s958_s16, %s823_s15  ;;  %s962_s22 = sld [smem:[#allocation5 + $0x101]] }
  0x1d   :  { %403 = vmatpush.msrb.mxu3 %v1135_v2  ;;  %473 = vmatpush.msrb.mxu1 %v1150_v7  ;;  %s965_s24 = sld [smem:[#allocation5 + $0x102]] }
  0x1e   :  { %336 = vmatpush.msrb.mxu2 %v1153_v9  ;;  %p835_p1 = scmp.gt.f32.partialorder %s961_s18, %s960_s17  ;;  %s1359_s16 = smov (!%p825_p0, %s958_s16), %s823_s15 }
  0x1f   :  { %404 = vmatpush.msrb.mxu3 %v1150_v7  ;;  %474 = vmatpush.msrb.mxu1 %v1153_v9  ;;  %s827_s23 = scalar_select %p825_p0, 1, 0 }
  0x20   :  { %p845_p2 = scmp.gt.f32.partialorder %s964_s20, %s963_s19  ;;  %s1361_s18 = smov (!%p835_p1, %s961_s18), %s960_s17 }
  0x21   :  { %405 = vmatpush.msrb.mxu3 %v1153_v9  ;;  %678 = vmatpush.msra.mxu1 %v1133_v1  ;;  %p829_p3 = scmp.gt.f32.partialorder %s959_s21, %s1359_s16 }
  0x22   :  { %s837_s25 = scalar_select %p835_p1, 1, 0 }
  0x23   :  { %679 = vmatpush.msra.mxu1 %v1135_v2  ;;  %s1363_s20 = smov (!%p845_p2, %s964_s20), %s963_s19  ;;  %p839_p4 = scmp.gt.f32.partialorder %s962_s22, %s1361_s18 }
  0x24   :  { %s1365_s23 = smov (%p829_p3, %s827_s23), 2  ;;  %p849_p5 = scmp.gt.f32.partialorder %s965_s24, %s1363_s20 }
  0x25   :  { %680 = vmatpush.msra.mxu1 %v1150_v7  ;;  %s847_s26 = scalar_select %p845_p2, 1, 0 }
  0x26   :  { %s1367_s25 = smov (%p839_p4, %s837_s25), 2 }
  0x27   :  { %681 = vmatpush.msra.mxu1 %v1153_v9  ;;  %s1369_s26 = smov (%p849_p5, %s847_s26), 2 }
  0x89   :  { %v1198_v39 = vpop.permute.xlu1 %288 }
  0x8e   :  { %v82_v13 = vpop.permute.xlu0 %81 }
  0x8f   :  { %vm134_vm2 = vcmp.eq.s32.totalorder %v82_v13, %v1183_v12 }
  0x90   :  { %v914_v15 = vsel %vm134_vm2, 1.0, %v1091_v14 }
  0x91   :  { %922 = vmatmul.msk.f32.vlgmr.msra.gmra.mxu0 %vm158_vm1, %v914_v15 }
  0x95   :  { %v262_v16 = vpop.f32.mrf.mxu1 }
 0x10e   :  { %v200_v17 = vpop.f32.mrf.mxu0 }
 0x10f   :  { %v265_v18 = vadd.f32 %v262_v16, %v200_v17 }
 0x111   :  { %v934_v19 = vmul.f32 -1.442695, %v265_v18 }
 0x113   :  { %983 = vpow2.f32 %v934_v19 }
 0x119   :  { %v984_v20 = vpop.eup %983 }
 0x11a   :  { %v269_v21 = vadd.f32 1.0, %v984_v20 }
 0x11c   :  { %985 = vrcp.f32 %v269_v21  ;;  %v281_v25 = vand.u32 2147483648, %v269_v21  ;;  %v279_v27 = vand.u32 2147483647, %v269_v21  ;;  %vm275_vm4 = vweird.f32 %v269_v21 }
 0x11e   :  { %v282_v29 = vor.u32 1.1754944e-38, %v281_v25  ;;  %vm280_vm6 = vcmp.eq.f32.partialorder %v279_v27, 8.507059e+37 }
 0x122   :  { %v986_v22 = vpop.eup %985 }
 0x123   :  { %v271_v23 = vmul.f32 %v986_v22, %v269_v21  ;;  %vm276_vm3 = vweird.f32 %v986_v22  ;;  %v118_v21 = vperm.slane %v1146_v4, 6 }
 0x124   :  { %vm277_vm5 = vmor %vm275_vm4, %vm276_vm3 }
 0x125   :  { %v272_v24 = vsub.f32 1.0, %v271_v23 }
 0x127   :  { %v273_v26 = vmul.f32 %v986_v22, %v272_v24 }
 0x129   :  { %v274_v28 = vadd.f32 %v986_v22, %v273_v26 }
 0x12b   :  { %v278_v30 = vsel %vm277_vm5, %v986_v22, %v274_v28  ;;  %v90_v22 = vperm.slane %v1146_v4, 2  ;;  %vm380_vm5 = vcmp.gt.s32.totalorder %v1217_v51, 1 }
 0x12c   :  { %v283_v31 = vsel %vm280_vm6, %v282_v29, %v278_v30  ;;  %v125_v29 = vperm.slane %v1146_v4, 7 }
 0x12d   :  { %v285_v32 = vmul.f32 2.0, %v283_v31  ;;  %v291_v40 = vmul.f32 %v1198_v39, %v283_v31 }
 0x12f   :  { %v935_v33 = vadd.f32 -1.0, %v285_v32 }
 0x131   :  { %293 = vrot.lane.b32.xlu0 %v935_v33, %s1092_s3 }
 0x139   :  { %116 = vperm.xlu0 %980, %v111_v34  }
 0x1a3   :  { %v294_v35 = vpop.permute.xlu0 %293 }
 0x1a4   :  { %v296_v36 = vmul.f32 %v294_v35, %v283_v31 }
 0x1a6   :  { %298 = vrot.lane.b32.xlu1 %v296_v36, %s1090_s10 }
 0x1ab   :  { %v117_v37 = vpop.permute.xlu0 %116 }
 0x1ac   :  { %vm139_vm7 = vcmp.eq.s32.totalorder %v117_v37, %v1183_v12 }
 0x1ad   :  { %v919_v38 = vsel %vm139_vm7, 1.0, %v1091_v14 }
 0x1ae   :  { %927 = vmatmul.msk.f32.vlgmr.msra.gmra.mxu2 %vm158_vm1, %v919_v38 }
 0x1af   :  { %540 = vmatpush.msra.mxu2 %v1133_v1 }
 0x1b1   :  { %541 = vmatpush.msra.mxu2 %v1135_v2 }
 0x1b3   :  { %542 = vmatpush.msra.mxu2 %v1150_v7 }
 0x1b5   :  { %543 = vmatpush.msra.mxu2 %v1153_v9 }
 0x218   :  { %v299_v41 = vpop.permute.xlu1 %298 }
 0x219   :  { %v1201_v42 = vadd.f32 %v299_v41, %v291_v40 }
 0x21b   :  { %987 = vtanh.f32 %v1201_v42 }
 0x221   :  { %v988_v43 = vpop.eup %987 }
 0x222   :  { %304 = vrot.lane.b32.xlu2 %v988_v43, %s1092_s3 }
 0x22a   :  { %311 = vrot.lane.b32.xlu2 %v1159_v10, %s1093_s11 }
 0x231   :  { %v1234_v58 = vpop.f32.mrf.mxu2 }
 0x232   :  { %88 = vperm.xlu2 %981, %v83_v44  }
 0x27c   :  { %v305_v48 = vpop.permute.xlu2 %304 }
 0x27d   :  { %v307_v52 = vmul.f32 %v305_v48, %v283_v31 }
 0x284   :  { %v312_v53 = vpop.permute.xlu2 %311 }
 0x285   :  { %v1222_v54 = vsel %vm308_vm11, %v307_v52, %v312_v53 }
 0x286   :  { %317 = vrot.lane.b32.xlu1 %v1222_v54, %s1090_s10 }
 0x28c   :  { %v89_v55 = vpop.permute.xlu2 %88 }
 0x28d   :  { %vm135_vm12 = vcmp.eq.s32.totalorder %v89_v55, %v1183_v12 }
 0x28e   :  { %v915_v56 = vsel %vm135_vm12, 1.0, %v1091_v14 }
 0x28f   :  { %923 = vmatmul.msk.f32.gmra.mxu0 %vm158_vm1, %v915_v56 }
 0x2f8   :  { %v318_v57 = vpop.permute.xlu1 %317 }
 0x2f9   :  { %936 = vmatmul.msk.f32.vlgmr.msrb.gmra.mxu2 %vm241_vm0, %v318_v57 }
 0x2fa   :  { %747 = vmatpush.msrb.mxu2 %v1133_v1 }
 0x2fc   :  { %748 = vmatpush.msrb.mxu2 %v1135_v2 }
 0x2fe   :  { %749 = vmatpush.msrb.mxu2 %v1150_v7 }
 0x300   :  { %750 = vmatpush.msrb.mxu2 %v1153_v9 }
 0x30c   :  { %v203_v59 = vpop.f32.mrf.mxu0 }
 0x37c   :  { %v338_v60 = vpop.f32.mrf.mxu2 }
 0x37d   :  { %v341_v61 = vadd.f32 %v338_v60, %v203_v59  ;;  %v97_v59 = vperm.slane %v1146_v4, 3 }
 0x37f   :  { %v937_v62 = vmul.f32 -1.442695, %v341_v61 }
 0x381   :  { %989 = vpow2.f32 %v937_v62 }
 0x387   :  { %v990_v63 = vpop.eup %989 }
 0x388   :  { %v345_v0 = vadd.f32 1.0, %v990_v63 }
 0x38a   :  { %991 = vrcp.f32 %v345_v0  ;;  %v357_v10 = vand.u32 2147483648, %v345_v0  ;;  %v355_v13 = vand.u32 2147483647, %v345_v0  ;;  %vm351_vm14 = vweird.f32 %v345_v0 }
 0x38c   :  { %v358_v16 = vor.u32 1.1754944e-38, %v357_v10  ;;  %vm356_vm2 = vcmp.eq.f32.partialorder %v355_v13, 8.507059e+37 }
 0x390   :  { %v992_v5 = vpop.eup %991 }
 0x391   :  { %v347_v6 = vmul.f32 %v992_v5, %v345_v0  ;;  %vm352_vm13 = vweird.f32 %v992_v5 }
 0x392   :  { %vm353_vm15 = vmor %vm351_vm14, %vm352_vm13 }
 0x393   :  { %v348_v8 = vsub.f32 1.0, %v347_v6 }
 0x395   :  { %v349_v11 = vmul.f32 %v992_v5, %v348_v8 }
 0x397   :  { %v350_v15 = vadd.f32 %v992_v5, %v349_v11 }
 0x399   :  { %v354_v17 = vsel %vm353_vm15, %v992_v5, %v350_v15  ;;  %vm449_vm15 = vcmp.gt.s32.totalorder %v1217_v51, 2 }
 0x39a   :  { %v359_v18 = vsel %vm356_vm2, %v358_v16, %v354_v17 }
 0x39b   :  { %v361_v19 = vmul.f32 2.0, %v359_v18 }
 0x39d   :  { %v938_v20 = vadd.f32 -1.0, %v361_v19 }
 0x39f   :  { %365 = vrot.lane.b32.xlu0 %v938_v20, %s1092_s3 }
 0x3a7   :  { %123 = vperm.xlu0 %980, %v118_v21  }
 0x3af   :  { %95 = vperm.xlu0 %980, %v90_v22  }
 0x411   :  { %v366_v23 = vpop.permute.xlu0 %365 }
 0x412   :  { %v368_v24 = vmul.f32 %v366_v23, %v359_v18 }
 0x414   :  { %370 = vrot.lane.b32.xlu1 %v368_v24, %s1090_s10 }
 0x419   :  { %v124_v25 = vpop.permute.xlu0 %123 }
 0x41a   :  { %vm140_vm3 = vcmp.eq.s32.totalorder %v124_v25, %v1183_v12 }
 0x41b   :  { %v920_v26 = vsel %vm140_vm3, 1.0, %v1091_v14 }
 0x41c   :  { %928 = vmatmul.msk.f32.vlgmr.msra.gmra.mxu3 %vm158_vm1, %v920_v26  ;;  %130 = vperm.xlu1 %982, %v125_v29  }
 0x41d   :  { %609 = vmatpush.msra.mxu3 %v1133_v1  ;;  %v315_v1 = vsel %vm308_vm11, %v1201_v42, %v1198_v39 }
 0x41f   :  { %610 = vmatpush.msra.mxu3 %v1135_v2  ;;  %v363_v2 = vmul.f32 %v359_v18, %v315_v1 }
 0x421   :  { %v96_v27 = vpop.permute.xlu0 %95  ;;  %611 = vmatpush.msra.mxu3 %v1150_v7 }
 0x422   :  { %vm136_vm4 = vcmp.eq.s32.totalorder %v96_v27, %v1183_v12 }
 0x423   :  { %v916_v28 = vsel %vm136_vm4, 1.0, %v1091_v14  ;;  %612 = vmatpush.msra.mxu3 %v1153_v9 }
 0x424   :  { %924 = vmatmul.msk.f32.gmra.mxu0 %vm158_vm1, %v916_v28 }
 0x486   :  { %v371_v30 = vpop.permute.xlu1 %370 }
 0x487   :  { %v373_v31 = vadd.f32 %v371_v30, %v363_v2 }
 0x489   :  { %993 = vtanh.f32 %v373_v31  ;;  %v384_v0 = vsel %vm380_vm5, %v373_v31, %v315_v1 }
 0x48e   :  { %v131_v34 = vpop.permute.xlu1 %130 }
 0x48f   :  { %v994_v7 = vpop.eup %993  ;;  %vm141_vm6 = vcmp.eq.s32.totalorder %v131_v34, %v1183_v12 }
 0x490   :  { %376 = vrot.lane.b32.xlu2 %v994_v7, %s1092_s3  ;;  %v921_v35 = vsel %vm141_vm6, 1.0, %v1091_v14 }
 0x491   :  { %929 = vmatmul.msk.f32.gmra.mxu3 %vm158_vm1, %v921_v35 }
 0x49f   :  { %v1265_v37 = vpop.f32.mrf.mxu3 }
 0x4a1   :  { %v206_v39 = vpop.f32.mrf.mxu0 }
 0x4ea   :  { %v377_v32 = vpop.permute.xlu2 %376 }
 0x4eb   :  { %v379_v33 = vmul.f32 %v377_v32, %v359_v18 }
 0x4ed   :  { %v383_v9 = vsel %vm380_vm5, %v379_v33, %v1222_v54 }
 0x4ee   :  { %386 = vrot.lane.b32.xlu2 %v383_v9, %s1090_s10 }
 0x514   :  { %v1267_v38 = vpop.f32.mrf.mxu3 }
 0x548   :  { %v387_v36 = vpop.permute.xlu2 %386 }
 0x549   :  { %939 = vmatmul.msk.f32.vlgmr.msrb.gmra.mxu3 %vm241_vm0, %v387_v36 }
 0x5cc   :  { %v407_v40 = vpop.f32.mrf.mxu3 }
 0x5cd   :  { %v410_v41 = vadd.f32 %v407_v40, %v206_v39 }
 0x5cf   :  { %v940_v42 = vmul.f32 -1.442695, %v410_v41 }
 0x5d1   :  { %995 = vpow2.f32 %v940_v42 }
 0x5d7   :  { %v996_v43 = vpop.eup %995 }
 0x5d8   :  { %v414_v44 = vadd.f32 1.0, %v996_v43 }
 0x5da   :  { %997 = vrcp.f32 %v414_v44  ;;  %v426_v48 = vand.u32 2147483648, %v414_v44  ;;  %v424_v50 = vand.u32 2147483647, %v414_v44  ;;  %vm420_vm11 = vweird.f32 %v414_v44 }
 0x5dc   :  { %v427_v53 = vor.u32 1.1754944e-38, %v426_v48  ;;  %vm425_vm13 = vcmp.eq.f32.partialorder %v424_v50, 8.507059e+37 }
 0x5e0   :  { %v998_v45 = vpop.eup %997 }
 0x5e1   :  { %v416_v46 = vmul.f32 %v998_v45, %v414_v44  ;;  %vm421_vm7 = vweird.f32 %v998_v45 }
 0x5e2   :  { %vm422_vm12 = vmor %vm420_vm11, %vm421_vm7  ;;  %vm518_vm7 = vcmp.gt.s32.totalorder %v1217_v51, 3 }
 0x5e3   :  { %v417_v47 = vsub.f32 1.0, %v416_v46 }
 0x5e5   :  { %v418_v49 = vmul.f32 %v998_v45, %v417_v47 }
 0x5e7   :  { %v419_v52 = vadd.f32 %v998_v45, %v418_v49 }
 0x5e9   :  { %v423_v54 = vsel %vm422_vm12, %v998_v45, %v419_v52 }
 0x5ea   :  { %v428_v55 = vsel %vm425_vm13, %v427_v53, %v423_v54 }
 0x5eb   :  { %v430_v56 = vmul.f32 2.0, %v428_v55  ;;  %v432_v5 = vmul.f32 %v428_v55, %v384_v0 }
 0x5ed   :  { %v941_v57 = vadd.f32 -1.0, %v430_v56 }
 0x5ef   :  { %434 = vrot.lane.b32.xlu1 %v941_v57, %s1092_s3 }
 0x5f7   :  { %102 = vperm.xlu1 %982, %v97_v59  }
 0x661   :  { %v435_v60 = vpop.permute.xlu1 %434 }
 0x662   :  { %v437_v61 = vmul.f32 %v435_v60, %v428_v55 }
 0x664   :  { %439 = vrot.lane.b32.xlu2 %v437_v61, %s1090_s10 }
 0x669   :  { %v103_v62 = vpop.permute.xlu1 %102 }
 0x66a   :  { %vm137_vm14 = vcmp.eq.s32.totalorder %v103_v62, %v1183_v12 }
 0x66b   :  { %v917_v63 = vsel %vm137_vm14, 1.0, %v1091_v14  ;;  %vm587_vm14 = vcmp.gt.s32.totalorder %v1217_v51, 4 }
 0x66c   :  { %925 = vmatmul.msk.f32.gmra.mxu0 %vm158_vm1, %v917_v63 }
 0x6be   :  { %v440_v6 = vpop.permute.xlu2 %439 }
 0x6bf   :  { %v442_v8 = vadd.f32 %v440_v6, %v432_v5 }
 0x6c1   :  { %999 = vtanh.f32 %v442_v8  ;;  %v453_v34 = vsel %vm449_vm15, %v442_v8, %v384_v0 }
 0x6c7   :  { %v1000_v10 = vpop.eup %999 }
 0x6c8   :  { %445 = vrot.lane.b32.xlu0 %v1000_v10, %s1092_s3 }
 0x6e9   :  { %v209_v17 = vpop.f32.mrf.mxu0 }
 0x73a   :  { %v446_v11 = vpop.permute.xlu0 %445 }
 0x73b   :  { %v448_v13 = vmul.f32 %v446_v11, %v428_v55 }
 0x73d   :  { %v452_v15 = vsel %vm449_vm15, %v448_v13, %v383_v9  ;;  %v104_v9 = vperm.slane %v1146_v4, 4 }
 0x73e   :  { %455 = vrot.lane.b32.xlu2 %v452_v15, %s1090_s10 }
 0x798   :  { %v456_v16 = vpop.permute.xlu2 %455 }
 0x799   :  { %942 = vmatmul.msk.f32.vlgmr.msrb.gmra.mxu1 %vm241_vm0, %v456_v16 }
 0x816   :  { %v476_v18 = vpop.f32.mrf.mxu1 }
 0x817   :  { %v479_v19 = vadd.f32 %v476_v18, %v209_v17 }
 0x819   :  { %v943_v20 = vmul.f32 -1.442695, %v479_v19 }
 0x81b   :  { %1001 = vpow2.f32 %v943_v20 }
 0x821   :  { %v1002_v21 = vpop.eup %1001 }
 0x822   :  { %v483_v22 = vadd.f32 1.0, %v1002_v21 }
 0x824   :  { %1003 = vrcp.f32 %v483_v22  ;;  %v495_v26 = vand.u32 2147483648, %v483_v22  ;;  %v493_v28 = vand.u32 2147483647, %v483_v22  ;;  %vm489_vm3 = vweird.f32 %v483_v22 }
 0x826   :  { %v496_v1 = vor.u32 1.1754944e-38, %v495_v26  ;;  %vm494_vm5 = vcmp.eq.f32.partialorder %v493_v28, 8.507059e+37 }
 0x82a   :  { %v1004_v23 = vpop.eup %1003 }
 0x82b   :  { %v485_v24 = vmul.f32 %v1004_v23, %v483_v22  ;;  %vm490_vm2 = vweird.f32 %v1004_v23 }
 0x82c   :  { %vm491_vm4 = vmor %vm489_vm3, %vm490_vm2 }
 0x82d   :  { %v486_v25 = vsub.f32 1.0, %v485_v24 }
 0x82f   :  { %v487_v27 = vmul.f32 %v1004_v23, %v486_v25 }
 0x831   :  { %v488_v29 = vadd.f32 %v1004_v23, %v487_v27 }
 0x833   :  { %v492_v2 = vsel %vm491_vm4, %v1004_v23, %v488_v29 }
 0x834   :  { %v497_v30 = vsel %vm494_vm5, %v496_v1, %v492_v2  ;;  %vm656_vm5 = vcmp.gt.s32.totalorder %v1217_v51, 5 }
 0x835   :  { %v499_v31 = vmul.f32 2.0, %v497_v30  ;;  %v501_v35 = vmul.f32 %v497_v30, %v453_v34 }
 0x837   :  { %v944_v7 = vadd.f32 -1.0, %v499_v31 }
 0x839   :  { %503 = vrot.lane.b32.xlu0 %v944_v7, %s1092_s3 }
 0x8ab   :  { %v504_v32 = vpop.permute.xlu0 %503 }
 0x8ac   :  { %v506_v33 = vmul.f32 %v504_v32, %v497_v30 }
 0x8ae   :  { %508 = vrot.lane.b32.xlu1 %v506_v33, %s1090_s10 }
 0x8b6   :  { %109 = vperm.xlu1 %982, %v104_v9  }
 0x920   :  { %v509_v36 = vpop.permute.xlu1 %508 }
 0x921   :  { %v511_v39 = vadd.f32 %v509_v36, %v501_v35 }
 0x923   :  { %1005 = vtanh.f32 %v511_v39  ;;  %v522_v6 = vsel %vm518_vm7, %v511_v39, %v453_v34 }
 0x928   :  { %v110_v40 = vpop.permute.xlu1 %109 }
 0x929   :  { %v1006_v41 = vpop.eup %1005  ;;  %vm138_vm6 = vcmp.eq.s32.totalorder %v110_v40, %v1183_v12 }
 0x92a   :  { %v918_v42 = vsel %vm138_vm6, 1.0, %v1091_v14  ;;  %514 = vrot.lane.b32.xlu2 %v1006_v41, %s1092_s3 }
 0x92b   :  { %926 = vmatmul.msk.f32.gmra.mxu0 %vm158_vm1, %v918_v42 }
 0x984   :  { %v515_v43 = vpop.permute.xlu2 %514 }
 0x985   :  { %v517_v4 = vmul.f32 %v515_v43, %v497_v30 }
 0x987   :  { %v521_v44 = vsel %vm518_vm7, %v517_v4, %v452_v15 }
 0x988   :  { %524 = vrot.lane.b32.xlu0 %v521_v44, %s1090_s10 }
 0x9a8   :  { %v212_v46 = vpop.f32.mrf.mxu0 }
 0x9fa   :  { %v525_v45 = vpop.permute.xlu0 %524 }
 0x9fb   :  { %945 = vmatmul.msk.f32.vlgmr.msra.gmra.mxu2 %vm241_vm0, %v525_v45 }
 0xa7e   :  { %v545_v12 = vpop.f32.mrf.mxu2 }
 0xa7f   :  { %v548_v47 = vadd.f32 %v545_v12, %v212_v46 }
 0xa81   :  { %v946_v14 = vmul.f32 -1.442695, %v548_v47 }
 0xa83   :  { %1007 = vpow2.f32 %v946_v14 }
 0xa89   :  { %v1008_v48 = vpop.eup %1007 }
 0xa8a   :  { %v552_v49 = vadd.f32 1.0, %v1008_v48 }
 0xa8c   :  { %1009 = vrcp.f32 %v552_v49  ;;  %v564_v54 = vand.u32 2147483648, %v552_v49  ;;  %v562_v56 = vand.u32 2147483647, %v552_v49  ;;  %vm558_vm11 = vweird.f32 %v552_v49 }
 0xa8e   :  { %v565_v59 = vor.u32 1.1754944e-38, %v564_v54  ;;  %vm563_vm13 = vcmp.eq.f32.partialorder %v562_v56, 8.507059e+37 }
 0xa92   :  { %v1010_v50 = vpop.eup %1009 }
 0xa93   :  { %v554_v52 = vmul.f32 %v1010_v50, %v552_v49  ;;  %vm559_vm1 = vweird.f32 %v1010_v50 }
 0xa94   :  { %vm560_vm12 = vmor %vm558_vm11, %vm559_vm1 }
 0xa95   :  { %v555_v53 = vsub.f32 1.0, %v554_v52 }
 0xa97   :  { %v556_v55 = vmul.f32 %v1010_v50, %v555_v53 }
 0xa99   :  { %v557_v57 = vadd.f32 %v1010_v50, %v556_v55 }
 0xa9b   :  { %v561_v60 = vsel %vm560_vm12, %v1010_v50, %v557_v57  ;;  %vm725_vm12 = vcmp.gt.s32.totalorder %v1217_v51, 6 }
 0xa9c   :  { %v566_v61 = vsel %vm563_vm13, %v565_v59, %v561_v60 }
 0xa9d   :  { %v568_v62 = vmul.f32 2.0, %v566_v61  ;;  %v570_v8 = vmul.f32 %v566_v61, %v522_v6 }
 0xa9f   :  { %v947_v63 = vadd.f32 -1.0, %v568_v62 }
 0xaa1   :  { %572 = vrot.lane.b32.xlu2 %v947_v63, %s1092_s3 }
 0xafb   :  { %v573_v0 = vpop.permute.xlu2 %572 }
 0xafc   :  { %v575_v5 = vmul.f32 %v573_v0, %v566_v61 }
 0xafe   :  { %577 = vrot.lane.b32.xlu0 %v575_v5, %s1090_s10 }
 0xb70   :  { %v578_v10 = vpop.permute.xlu0 %577 }
 0xb71   :  { %v580_v11 = vadd.f32 %v578_v10, %v570_v8 }
 0xb73   :  { %1011 = vtanh.f32 %v580_v11  ;;  %v591_v9 = vsel %vm587_vm14, %v580_v11, %v522_v6 }
 0xb79   :  { %v1012_v13 = vpop.eup %1011 }
 0xb7a   :  { %583 = vrot.lane.b32.xlu1 %v1012_v13, %s1092_s3 }
 0xbec   :  { %v584_v15 = vpop.permute.xlu1 %583 }
 0xbed   :  { %v586_v16 = vmul.f32 %v584_v15, %v566_v61 }
 0xbef   :  { %v590_v17 = vsel %vm587_vm14, %v586_v16, %v521_v44 }
 0xbf0   :  { %593 = vrot.lane.b32.xlu2 %v590_v17, %s1090_s10 }
 0xc4a   :  { %v594_v18 = vpop.permute.xlu2 %593 }
 0xc4b   :  { %948 = vmatmul.msk.f32.vlgmr.msra.gmra.mxu3 %vm241_vm0, %v594_v18 }
 0xcce   :  { %v614_v19 = vpop.f32.mrf.mxu3 }
 0xccf   :  { %v617_v20 = vadd.f32 %v614_v19, %v1234_v58 }
 0xcd1   :  { %v949_v21 = vmul.f32 -1.442695, %v617_v20 }
 0xcd3   :  { %1013 = vpow2.f32 %v949_v21 }
 0xcd9   :  { %v1014_v22 = vpop.eup %1013 }
 0xcda   :  { %v621_v23 = vadd.f32 1.0, %v1014_v22 }
 0xcdc   :  { %1015 = vrcp.f32 %v621_v23  ;;  %v633_v27 = vand.u32 2147483648, %v621_v23  ;;  %v631_v29 = vand.u32 2147483647, %v621_v23  ;;  %vm627_vm2 = vweird.f32 %v621_v23 }
 0xcde   :  { %v634_v2 = vor.u32 1.1754944e-38, %v633_v27  ;;  %vm632_vm4 = vcmp.eq.f32.partialorder %v631_v29, 8.507059e+37 }
 0xce2   :  { %v1016_v24 = vpop.eup %1015 }
 0xce3   :  { %v623_v25 = vmul.f32 %v1016_v24, %v621_v23  ;;  %vm628_vm15 = vweird.f32 %v1016_v24 }
 0xce4   :  { %vm629_vm3 = vmor %vm627_vm2, %vm628_vm15 }
 0xce5   :  { %v624_v26 = vsub.f32 1.0, %v623_v25 }
 0xce7   :  { %v625_v28 = vmul.f32 %v1016_v24, %v624_v26 }
 0xce9   :  { %v626_v1 = vadd.f32 %v1016_v24, %v625_v28 }
 0xceb   :  { %v630_v30 = vsel %vm629_vm3, %v1016_v24, %v626_v1  ;;  %vm794_vm3 = vcmp.gt.s32.totalorder %v1217_v51, 7  ;;  %v831_v51 = vstv %s1365_s23 }
 0xcec   :  { %v635_v31 = vsel %vm632_vm4, %v634_v2, %v630_v30 }
 0xced   :  { %v637_v58 = vmul.f32 2.0, %v635_v31  ;;  %v639_v34 = vmul.f32 %v635_v31, %v591_v9 }
 0xcef   :  { %v950_v7 = vadd.f32 -1.0, %v637_v58 }
 0xcf1   :  { %641 = vrot.lane.b32.xlu0 %v950_v7, %s1092_s3 }
 0xd63   :  { %v642_v32 = vpop.permute.xlu0 %641 }
 0xd64   :  { %v644_v33 = vmul.f32 %v642_v32, %v635_v31 }
 0xd66   :  { %646 = vrot.lane.b32.xlu1 %v644_v33, %s1090_s10  ;;  %v70_v33 = vld [vmem:[#allocation7 + $0x48] sm:$0xff] }
 0xd67   :  { %815 = vmatpush.msrb.mxu3 %v70_v33 }
 0xdd8   :  { %v647_v35 = vpop.permute.xlu1 %646 }
 0xdd9   :  { %v649_v36 = vadd.f32 %v647_v35, %v639_v34  ;;  %v68_v34 = vld [vmem:[#allocation7 + $0x38] sm:$0xff]  ;;  %v67_v35 = vld [vmem:[#allocation7 + $0x30] sm:$0xff] }
 0xddb   :  { %1017 = vtanh.f32 %v649_v36  ;;  %v660_v61 = vsel %vm656_vm5, %v649_v36, %v591_v9  ;;  %v69_v9 = vld [vmem:[#allocation7 + $0x40] sm:$0xff] }
 0xddc   :  { %816 = vmatpush.msrb.mxu3 %v69_v9 }
 0xdde   :  { %817 = vmatpush.msrb.mxu3 %v68_v34 }
 0xde0   :  { %818 = vmatpush.msrb.mxu3 %v67_v35 }
 0xde1   :  { %v1018_v39 = vpop.eup %1017 }
 0xde2   :  { %652 = vrot.lane.b32.xlu2 %v1018_v39, %s1092_s3 }
 0xe3c   :  { %v653_v40 = vpop.permute.xlu2 %652 }
 0xe3d   :  { %v655_v41 = vmul.f32 %v653_v40, %v635_v31 }
 0xe3f   :  { %v659_v42 = vsel %vm656_vm5, %v655_v41, %v590_v17 }
 0xe40   :  { %662 = vrot.lane.b32.xlu0 %v659_v42, %s1090_s10 }
 0xeb2   :  { %v663_v43 = vpop.permute.xlu0 %662 }
 0xeb3   :  { %951 = vmatmul.msk.f32.vlgmr.msra.gmra.mxu1 %vm241_vm0, %v663_v43  ;;  %v841_v43 = vstv %s1367_s25 }
 0xf30   :  { %v683_v4 = vpop.f32.mrf.mxu1 }
 0xf31   :  { %v686_v44 = vadd.f32 %v683_v4, %v1265_v37 }
 0xf33   :  { %v952_v45 = vmul.f32 -1.442695, %v686_v44  ;;  %v851_v44 = vstv %s1369_s26 }
 0xf35   :  { %1019 = vpow2.f32 %v952_v45 }
 0xf3b   :  { %v1020_v46 = vpop.eup %1019 }
 0xf3c   :  { %v690_v12 = vadd.f32 1.0, %v1020_v46 }
 0xf3e   :  { %1021 = vrcp.f32 %v690_v12  ;;  %v702_v49 = vand.u32 2147483648, %v690_v12  ;;  %v700_v52 = vand.u32 2147483647, %v690_v12  ;;  %vm696_vm7 = vweird.f32 %v690_v12 }
 0xf40   :  { %v703_v54 = vor.u32 1.1754944e-38, %v702_v49  ;;  %vm701_vm11 = vcmp.eq.f32.partialorder %v700_v52, 8.507059e+37 }
 0xf44   :  { %v1022_v47 = vpop.eup %1021 }
 0xf45   :  { %v692_v14 = vmul.f32 %v1022_v47, %v690_v12  ;;  %vm697_vm6 = vweird.f32 %v1022_v47 }
 0xf46   :  { %vm698_vm1 = vmor %vm696_vm7, %vm697_vm6 }
 0xf47   :  { %v693_v48 = vsub.f32 1.0, %v692_v14 }
 0xf49   :  { %v694_v50 = vmul.f32 %v1022_v47, %v693_v48 }
 0xf4b   :  { %v695_v53 = vadd.f32 %v1022_v47, %v694_v50 }
 0xf4d   :  { %v699_v55 = vsel %vm698_vm1, %v1022_v47, %v695_v53  ;;  %v74_v53 = vld [vmem:[#allocation7 + $0x68] sm:$0xff] }
 0xf4e   :  { %v704_v56 = vsel %vm701_vm11, %v703_v54, %v699_v55  ;;  %898 = vmatpush.msrb.mxu1 %v74_v53  ;;  %v72_v54 = vld [vmem:[#allocation7 + $0x58] sm:$0xff]  ;;  %v71_v55 = vld [vmem:[#allocation7 + $0x50] sm:$0xff] }
 0xf4f   :  { %v706_v37 = vmul.f32 2.0, %v704_v56  ;;  %v708_v62 = vmul.f32 %v704_v56, %v660_v61 }
 0xf50   :  { %899 = vmatpush.msrb.mxu1 %v73_v3 }
 0xf51   :  { %v953_v57 = vadd.f32 -1.0, %v706_v37 }
 0xf52   :  { %900 = vmatpush.msrb.mxu1 %v72_v54 }
 0xf53   :  { %710 = vrot.lane.b32.xlu1 %v953_v57, %s1092_s3 }
 0xf54   :  { %901 = vmatpush.msrb.mxu1 %v71_v55 }
 0xfc5   :  { %v711_v59 = vpop.permute.xlu1 %710 }
 0xfc6   :  { %v713_v60 = vmul.f32 %v711_v59, %v704_v56 }
 0xfc8   :  { %715 = vrot.lane.b32.xlu2 %v713_v60, %s1090_s10 }
0x1022   :  { %v716_v63 = vpop.permute.xlu2 %715 }
0x1023   :  { %v718_v0 = vadd.f32 %v716_v63, %v708_v62 }
0x1025   :  { %1023 = vtanh.f32 %v718_v0  ;;  %v729_v30 = vsel %vm725_vm12, %v718_v0, %v660_v61 }
0x102b   :  { %v1024_v5 = vpop.eup %1023 }
0x102c   :  { %721 = vrot.lane.b32.xlu0 %v1024_v5, %s1092_s3 }
0x109e   :  { %v722_v6 = vpop.permute.xlu0 %721 }
0x109f   :  { %v724_v8 = vmul.f32 %v722_v6, %v704_v56 }
0x10a1   :  { %v728_v10 = vsel %vm725_vm12, %v724_v8, %v659_v42  ;;  %v832_v42 = vsel %vm226_vm8, %v831_v51, 0 }
0x10a2   :  { %731 = vrot.lane.b32.xlu1 %v728_v10, %s1090_s10  ;;  %v842_v4 = vsel %vm230_vm9, %v841_v43, %v832_v42 }
0x10a3   :  { %v852_v45 = vsel %vm234_vm10, %v851_v44, %v842_v4 }
0x10a4   :  { %vm867_vm4 = vcmp.eq.s32.totalorder %v852_v45, 2  ;;  %vm858_vm5 = vcmp.eq.s32.totalorder %v852_v45, 1  ;;  %vm853_vm6 = vcmp.eq.s32.totalorder %v852_v45, 0 }
0x1114   :  { %v732_v11 = vpop.permute.xlu1 %731 }
0x1115   :  { %954 = vmatmul.msk.f32.vlgmr.msrb.gmra.mxu2 %vm241_vm0, %v732_v11 }
0x1198   :  { %v752_v13 = vpop.f32.mrf.mxu2 }
0x1199   :  { %v755_v15 = vadd.f32 %v752_v13, %v1267_v38 }
0x119b   :  { %v955_v16 = vmul.f32 -1.442695, %v755_v15 }
0x119d   :  { %1025 = vpow2.f32 %v955_v16 }
0x11a3   :  { %v1026_v17 = vpop.eup %1025 }
0x11a4   :  { %v759_v18 = vadd.f32 1.0, %v1026_v17 }
0x11a6   :  { %1027 = vrcp.f32 %v759_v18  ;;  %v771_v22 = vand.u32 2147483648, %v759_v18  ;;  %v769_v24 = vand.u32 2147483647, %v759_v18  ;;  %vm765_vm14 = vweird.f32 %v759_v18 }
0x11a8   :  { %v772_v26 = vor.u32 1.1754944e-38, %v771_v22  ;;  %vm770_vm2 = vcmp.eq.f32.partialorder %v769_v24, 8.507059e+37 }
0x11ac   :  { %v1028_v19 = vpop.eup %1027 }
0x11ad   :  { %v761_v20 = vmul.f32 %v1028_v19, %v759_v18  ;;  %vm766_vm13 = vweird.f32 %v1028_v19 }
0x11ae   :  { %vm767_vm15 = vmor %vm765_vm14, %vm766_vm13 }
0x11af   :  { %v762_v21 = vsub.f32 1.0, %v761_v20 }
0x11b1   :  { %v763_v23 = vmul.f32 %v1028_v19, %v762_v21 }
0x11b3   :  { %v764_v25 = vadd.f32 %v1028_v19, %v763_v23 }
0x11b5   :  { %v768_v27 = vsel %vm767_vm15, %v1028_v19, %v764_v25 }
0x11b6   :  { %v773_v28 = vsel %vm770_vm2, %v772_v26, %v768_v27 }
0x11b7   :  { %v775_v38 = vmul.f32 2.0, %v773_v28  ;;  %v777_v31 = vmul.f32 %v773_v28, %v729_v30 }
0x11b9   :  { %v956_v29 = vadd.f32 -1.0, %v775_v38 }
0x11bb   :  { %779 = vrot.lane.b32.xlu2 %v956_v29, %s1092_s3 }
0x1215   :  { %v780_v1 = vpop.permute.xlu2 %779 }
0x1216   :  { %v782_v2 = vmul.f32 %v780_v1, %v773_v28 }
0x1218   :  { %784 = vrot.lane.b32.xlu0 %v782_v2, %s1090_s10 }
0x128a   :  { %v785_v58 = vpop.permute.xlu0 %784 }
0x128b   :  { %v787_v7 = vadd.f32 %v785_v58, %v777_v31 }
0x128d   :  { %1029 = vtanh.f32 %v787_v7 }
0x1293   :  { %v1030_v32 = vpop.eup %1029 }
0x1294   :  { %790 = vrot.lane.b32.xlu1 %v1030_v32, %s1092_s3 }
0x1306   :  { %v791_v36 = vpop.permute.xlu1 %790 }
0x1307   :  { %v793_v39 = vmul.f32 %v791_v36, %v773_v28 }
0x1309   :  { %v797_v40 = vsel %vm794_vm3, %v793_v39, %v728_v10 }
0x130a   :  { %799 = vrot.lane.b32.xlu2 %v797_v40, %s1090_s10 }
0x1364   :  { %v800_v41 = vpop.permute.xlu2 %799 }
0x1365   :  { %957 = vmatmul.msk.f32.vlgmr.msrb.gmra.mxu3 %vm241_vm0, %v800_v41 }
0x13e8   :  { %v820_v46 = vpop.f32.mrf.mxu3 }
0x13e9   :  { %v870_v12 = vsel %vm867_vm4, %v820_v46, 0.0  ;;  %v861_v47 = vsel %vm858_vm5, %v820_v46, 0.0  ;;  %v856_v14 = vsel %vm853_vm6, %v820_v46, 0.0 }
0x13ea   :  { %872 = vrot.lane.b32.xlu1 %v870_v12, %s1092_s3  ;;  %863 = vrot.lane.b32.xlu0 %v861_v47, %s1093_s11 }
0x145c   :  { %v864_v48 = vpop.permute.xlu0 %863  ;;  %v873_v50 = vpop.permute.xlu1 %872 }
0x145d   :  { %v866_v49 = vadd.f32 %v864_v48, %v856_v14 }
0x145f   :  { %v875_v52 = vadd.f32 %v873_v50, %v866_v49 }
0x1461   :  { %877 = vrot.lane.b32.xlu2 %v875_v52, %s1093_s11 }
0x14bb   :  { %v878_v56 = vpop.permute.xlu2 %877 }
0x14bc   :  { %v880_v37 = vadd.f32 %v878_v56, %v797_v40 }
0x14be   :  { %882 = vrot.lane.b32.xlu0 %v880_v37, %s1090_s10 }
0x1530   :  { %v883_v57 = vpop.permute.xlu0 %882 }
0x1531   :  { %966 = vmatmul.msk.f32.vlgmr.msrb.gmra.mxu1 %vm241_vm0, %v883_v57 }
0x15ae   :  { %v903_v59 = vpop.f32.mrf.mxu1 }
0x15af   :  { %906 = vst [vmem:[%s1357_s5] sm:$0xff] %v903_v59 }
0x15b0   :  { %911 = vsyncpa [#allocation3], 1 }
0x15b1   :  { %912 = vsyncpa [#allocation4], 1 }
0x15b2   :  { %913 = vsyncpa [#allocation6], 1 }

</bundles_post_ra>
